<compile_context>
chip_gen: v7x
topology: tpu7x:2x2x1
jax: 0.10.0
libtpu: 0.0.40
codegen_flags: <defaults>
</compile_context>

<pallas_src>
import jax
import jax.numpy as jnp
from jax import lax
from jax.experimental import pallas as pl
from jax.experimental.pallas import tpu as pltpu


# ---------------------------------------------------------------------------
# Generation-aware VMEM budgeting (lane-padding aware).
# ---------------------------------------------------------------------------
def _vmem_config():
    """Returns (per-step tile budget bytes, vmem_limit_bytes) per TPU gen."""
    cap = None
    try:  # host-side config query only; never hides kernel lowering errors
        cap = getattr(pltpu.get_tpu_info(), "vmem_capacity_bytes", None)
    except Exception:
        cap = None
    if cap is not None and cap >= 96 * 1024 * 1024:
        # v5e / v6e: 128 MiB VMEM -> big tiles, generous scoped limit.
        return 32 * 1024 * 1024, 100 * 1024 * 1024
    # v7x (64 MiB VMEM) or unknown: keep headroom for double-buffers/scratch.
    return 12 * 1024 * 1024, 48 * 1024 * 1024


def _padded_vmem_bytes(shape, itemsize):
    """VMEM footprint with (sublane, lane) = (8*4/itemsize, 128) tile padding."""
    s = list(shape)
    sub = 8 * (4 // itemsize) if itemsize in (1, 2, 4) else 8
    if len(s) >= 1:
        s[-1] = -(-s[-1] // 128) * 128
    if len(s) >= 2:
        s[-2] = -(-s[-2] // sub) * sub
    n = 1
    for d in s:
        n *= d
    return n * itemsize


def _pick_tile(D, N, bytes_fn, budget):
    """Largest divisor D-tile fitting `budget`, keeping >= 2 grid steps."""
    divisors = [t for t in range(1, D + 1) if D % t == 0]
    fits = [t for t in divisors if bytes_fn(t) <= budget]
    td = max(fits) if fits else 1
    if N * (D // td) < 2:  # keep both v7x TensorCores busy / allow pipelining
        cand = [t for t in (fits or divisors) if D // t >= 2]
        if cand:
            td = max(cand)
    return td


def _use_banded(W, Cin, Cout):
    """Banded-weight single-matmul path only when the big weight stays small."""
    big_bytes = 9 * (W + 2) * Cin * W * Cout * 2
    return (W * Cout) <= 2048 and big_bytes <= (4 << 20)


# ---------------------------------------------------------------------------
# Host-side weight re-layouts.
# ---------------------------------------------------------------------------
def _build_banded_weight(w, W):
    """w: (3,3,3,Cin,Cout) -> block-banded (9*(W+2)*Cin, W*Cout).

    BigW[((kd*3+kh)*(W+2)+wp)*Cin + ci, w_out*Cout + co] =
        w[kd, kh, wp - w_out, ci, co]  if 0 <= wp - w_out < 3 else 0,
    so one MXU matmul over the lane-merged (w, cin) axis performs all kw taps
    (kd, kh are handled by 9 shifted LHS slices merged into K).
    """
    _, _, _, Cin, Cout = w.shape
    Wp = W + 2
    wp = jnp.arange(Wp)[:, None]
    wo = jnp.arange(W)[None, :]
    big = jnp.zeros((3, 3, Wp, Cin, W, Cout), w.dtype)
    for kw in range(3):
        mask = (wp == wo + kw).astype(w.dtype)                    # (Wp, W)
        big = big + jnp.einsum("pw,dhio->dhpiwo", mask, w[:, :, kw])
    return big.reshape(9 * Wp * Cin, W * Cout)


# ---------------------------------------------------------------------------
# Pass 1 kernels: Conv3d(k=3, pad=1) + bias, with per-tile GN(1,C) partials.
# ---------------------------------------------------------------------------
def _conv_banded_kernel(x_ref, w_ref, b_ref, y_ref, st_ref):
    # x_ref : (1, TD+2, H+2, (W+2)*Cin)   bf16 lane-merged halo slab
    # w_ref : (9*(W+2)*Cin, W*Cout)       bf16 block-banded weight
    # b_ref : (1, W*Cout)                 f32 bias tiled over lanes
    # y_ref : (1, TD, H, W*Cout)          bf16 lane-dense conv+bias output
    # st_ref: (1, 1, 2, W*Cout)           f32 per-tile [sum; sumsq] partials
    _, TD, H, WC = y_ref.shape
    WpC = x_ref.shape[-1]

    slab = x_ref[0]                                   # (TD+2, H+2, WpC)
    # Merge the 9 (kd, kh) taps into the contraction dim; the kw taps live in
    # the banded weight -> a single deep matmul, accumulated in registers.
    lhs = jnp.concatenate(
        [slab[kd:kd + TD, kh:kh + H, :] for kd in range(3) for kh in range(3)],
        axis=-1).reshape(TD * H, 9 * WpC)             # bf16, lane-dense
    acc = jnp.dot(lhs, w_ref[...],
                  preferred_element_type=jnp.float32)  # (TD*H, W*Cout) f32

    y = acc + b_ref[...]
    y_ref[...] = y.reshape(1, TD, H, WC).astype(y_ref.dtype)
    # GN statistics from the f32 accumulator (before the bf16 cast).
    s1 = jnp.sum(y, axis=0, keepdims=True)
    s2 = jnp.sum(y * y, axis=0, keepdims=True)
    st_ref[...] = jnp.concatenate([s1, s2], axis=0).reshape(1, 1, 2, WC)


def _conv_taps_kernel(x_ref, w_ref, b_ref, y_ref, st_ref):
    # Fallback for large channel counts: 3 matmuls of K = 9*Cin (kh, kw merged
    # into K), register accumulation, lane-dense store.
    _, TD, H, WC = y_ref.shape
    Cout = w_ref.shape[-1]
    W = WC // Cout
    Cin = x_ref.shape[-1] // (W + 2)
    TM = TD * H * W

    slab = x_ref[0].reshape(TD + 2, H + 2, W + 2, Cin)
    acc = jnp.zeros((TM, Cout), jnp.float32)
    for kd in range(3):
        lhs = jnp.concatenate(
            [slab[kd:kd + TD, kh:kh + H, kw:kw + W, :]
             for kh in range(3) for kw in range(3)],
            axis=-1).reshape(TM, 9 * Cin)
        acc = acc + jnp.dot(lhs, w_ref[kd], preferred_element_type=jnp.float32)

    y = acc.reshape(TD * H, WC) + b_ref[...]
    y_ref[...] = y.reshape(1, TD, H, WC).astype(y_ref.dtype)
    s1 = jnp.sum(y, axis=0, keepdims=True)
    s2 = jnp.sum(y * y, axis=0, keepdims=True)
    st_ref[...] = jnp.concatenate([s1, s2], axis=0).reshape(1, 1, 2, WC)


def _conv_bias_pass(x_pad_m, w_p, b_t, *, D, H, W, Cin, Cout, TD, banded,
                    vmem_limit):
    N = x_pad_m.shape[0]
    n_dt = D // TD
    Hp = H + 2
    WpC = (W + 2) * Cin
    WC = W * Cout

    if n_dt == 1:
        x_spec = pl.BlockSpec((1, D + 2, Hp, WpC), lambda n, dt: (n, 0, 0, 0))
    else:
        # Overlapping halo windows along D (element-offset indexing); Pallas
        # auto double-buffers the DMA across grid steps.
        x_spec = pl.BlockSpec((1, pl.Element(TD + 2), Hp, WpC),
                              lambda n, dt: (n, dt * TD, 0, 0))
    w_spec = pl.BlockSpec(w_p.shape, lambda n, dt: (0,) * len(w_p.shape))
    b_spec = pl.BlockSpec((1, WC), lambda n, dt: (0, 0))
    y_spec = pl.BlockSpec((1, TD, H, WC), lambda n, dt: (n, dt, 0, 0))
    st_spec = pl.BlockSpec((1, 1, 2, WC), lambda n, dt: (n, dt, 0, 0))

    kernel = _conv_banded_kernel if banded else _conv_taps_kernel
    k_depth = (9 * (W + 2) * Cin) if banded else (27 * Cin)
    flops = 2 * N * D * H * W * Cout * k_depth
    bytes_accessed = (N * (D + 2) * Hp * WpC * 2          # bf16 halo input
                      + w_p.size * 2                       # bf16 weights
                      + N * D * H * WC * 2                 # bf16 conv output
                      + N * n_dt * 2 * WC * 4)             # f32 GN partials

    return pl.pallas_call(
        kernel,
        grid=(N, n_dt),
        in_specs=[x_spec, w_spec, b_spec],
        out_specs=[y_spec, st_spec],
        out_shape=[jax.ShapeDtypeStruct((N, D, H, WC), jnp.bfloat16),
                   jax.ShapeDtypeStruct((N, n_dt, 2, WC), jnp.float32)],
        compiler_params=pltpu.CompilerParams(
            dimension_semantics=("parallel", "parallel"),
            vmem_limit_bytes=vmem_limit),
        cost_estimate=pl.CostEstimate(flops=flops, transcendentals=0,
                                      bytes_accessed=bytes_accessed),
    )(x_pad_m, w_p, b_t)


# ---------------------------------------------------------------------------
# Pass 2: lane-dense GroupNorm finalize (y*scale + shift) + ReLU.
# ---------------------------------------------------------------------------
def _norm_relu_kernel(y_ref, s_ref, t_ref, o_ref):
    y = y_ref[...].astype(jnp.float32)              # (1, TD2, H, W*C)
    o = y * s_ref[0, 0] + t_ref[0, 0]               # per-(w, c) lane vectors
    o_ref[...] = jnp.maximum(o, 0.0).astype(o_ref.dtype)


def _norm_relu_pass(y, scale, shift, TD2, out_dtype, vmem_limit):
    N, D, H, WC = y.shape
    n_dt = D // TD2
    blk = pl.BlockSpec((1, TD2, H, WC), lambda n, dt: (n, dt, 0, 0))
    vec = pl.BlockSpec((1, 1, WC), lambda n, dt: (n, 0, 0))
    return pl.pallas_call(
        _norm_relu_kernel,
        grid=(N, n_dt),
        in_specs=[blk, vec, vec],
        out_specs=blk,
        out_shape=jax.ShapeDtypeStruct((N, D, H, WC), out_dtype),
        compiler_params=pltpu.CompilerParams(
            dimension_semantics=("parallel", "parallel"),
            vmem_limit_bytes=vmem_limit),
    )(y, scale, shift)


# ---------------------------------------------------------------------------
# One Conv3d -> GroupNorm(1, C) -> ReLU layer.
# ---------------------------------------------------------------------------
def _conv_gn_relu_layer(x_cl, w, b, gamma, beta, *, out_dtype, budget,
                        vmem_limit):
    """x_cl: (N, D, H, W, Cin) channels-last.  Returns (N, D, H, W*Cout)."""
    N, D, H, W, Cin = x_cl.shape
    Cout = w.shape[-1]
    WC = W * Cout
    WpC = (W + 2) * Cin
    banded = _use_banded(W, Cin, Cout)

    # Halo pad once in bf16 and carry the activation lane-merged so in-kernel
    # vregs are lane-dense ((W+2)*Cin last dim rather than Cin).
    x_pad = jnp.pad(x_cl.astype(jnp.bfloat16),
                    ((0, 0), (1, 1), (1, 1), (1, 1), (0, 0)))
    x_pad_m = x_pad.reshape(N, D + 2, H + 2, WpC)

    if banded:
        w_p = _build_banded_weight(w, W).astype(jnp.bfloat16)
    else:
        w_p = w.reshape(3, 9 * Cin, Cout).astype(jnp.bfloat16)
    b_t = jnp.tile(b, W).reshape(1, WC).astype(jnp.float32)

    # Conv tile size: lane-padding-aware VMEM accounting vs per-gen budget.
    def conv_bytes(td):
        xb = 2 * _padded_vmem_bytes((td + 2, H + 2, WpC), 2)
        yb = 2 * _padded_vmem_bytes((td, H, WC), 2)
        wb = 2 * _padded_vmem_bytes(w_p.shape, 2)
        if banded:
            lhs = _padded_vmem_bytes((td * H, 9 * WpC), 2)
        else:
            lhs = _padded_vmem_bytes((td * H * W, 9 * Cin), 2)
        acc = 2 * _padded_vmem_bytes((td * H, WC), 4)
        return xb + yb + wb + lhs + acc

    TD = _pick_tile(D, N, conv_bytes, budget)
    y, st = _conv_bias_pass(x_pad_m, w_p, b_t, D=D, H=H, W=W, Cin=Cin,
                            Cout=Cout, TD=TD, banded=banded,
                            vmem_limit=vmem_limit)

    # Finish GroupNorm(1, C) statistics from the tiny per-tile partials.
    count = D * H * W * Cout
    total = jnp.sum(st[:, :, 0, :], axis=(1, 2))              # (N,)
    totsq = jnp.sum(st[:, :, 1, :], axis=(1, 2))              # (N,)
    mean = total / count
    # TODO(synk): per-tile centered partials would avoid E[x^2]-E[x]^2
    #             cancellation for very large D*H*W*C; clamp guards the f32 case.
    var = jnp.maximum(totsq / count - mean * mean, 0.0)       # biased, as PyTorch
    rstd = lax.rsqrt(var + 1e-5)

    gamma_t = jnp.tile(gamma, W)                              # (W*Cout,)
    beta_t = jnp.tile(beta, W)
    scale = (rstd[:, None] * gamma_t[None, :]).reshape(N, 1, WC)
    shift = (beta_t[None, :]
             - (mean * rstd)[:, None] * gamma_t[None, :]).reshape(N, 1, WC)

    # GN/ReLU pass gets its own, larger tile (pure HBM roofline pass).
    out_size = jnp.dtype(out_dtype).itemsize

    def gn_bytes(td):
        return (2 * _padded_vmem_bytes((td, H, WC), 2)
                + 2 * _padded_vmem_bytes((td, H, WC), out_size))

    TD2 = _pick_tile(D, N, gn_bytes, budget)
    return _norm_relu_pass(y, scale, shift, TD2, out_dtype, vmem_limit)


def double_conv(x, params):
    """Pallas DoubleConv.  x: (N, C, D, H, W) NCDHW like PyTorch."""
    N, _, D, H, W = x.shape
    Cmid = params["w1"].shape[-1]
    Cout = params["w2"].shape[-1]
    budget, vmem_limit = _vmem_config()

    # Boundary transposes only (module contract is NCDHW); everything in
    # between stays channels-last / lane-merged.
    x_cl = jnp.transpose(x, (0, 2, 3, 4, 1))                  # -> NDHWC

    a1 = _conv_gn_relu_layer(x_cl, params["w1"], params["b1"],
                             params["g1"], params["bt1"],
                             out_dtype=jnp.bfloat16,
                             budget=budget, vmem_limit=vmem_limit)
    a1 = a1.reshape(N, D, H, W, Cmid)                         # un-merge lanes

    a2 = _conv_gn_relu_layer(a1, params["w2"], params["b2"],
                             params["g2"], params["bt2"],
                             out_dtype=jnp.float32,
                             budget=budget, vmem_limit=vmem_limit)
    a2 = a2.reshape(N, D, H, W, Cout)

    return jnp.transpose(a2, (0, 4, 1, 2, 3))                 # -> NCDHW


# ---------------------------------------------------------------------------
# Pure-JAX reference matching the PyTorch module semantics.
# ---------------------------------------------------------------------------
def double_conv_ref(x, params):
    def block(x, w, b, gamma, beta):
        w_oidhw = jnp.transpose(w, (4, 3, 0, 1, 2))           # (Cout,Cin,3,3,3)
        y = lax.conv_general_dilated(
            x, w_oidhw, window_strides=(1, 1, 1),
            padding=((1, 1), (1, 1), (1, 1)),
            dimension_numbers=("NCDHW", "OIDHW", "NCDHW"),
            precision=lax.Precision.HIGHEST)
        y = y + b.reshape(1, -1, 1, 1, 1)
        mean = jnp.mean(y, axis=(1, 2, 3, 4), keepdims=True)
        var = jnp.var(y, axis=(1, 2, 3, 4), keepdims=True)
        yn = (y - mean) / jnp.sqrt(var + 1e-5)
        yn = yn * gamma.reshape(1, -1, 1, 1, 1) + beta.reshape(1, -1, 1, 1, 1)
        return jnp.maximum(yn, 0.0)

    y1 = block(x, params["w1"], params["b1"], params["g1"], params["bt1"])
    return block(y1, params["w2"], params["b2"], params["g2"], params["bt2"])


def init_params(key, in_ch, mid_ch, out_ch):
    ks = jax.random.split(key, 8)
    return {
        # conv weights stored as (kd, kh, kw, Cin, Cout)
        "w1": 0.1 * jax.random.normal(ks[0], (3, 3, 3, in_ch, mid_ch), jnp.float32),
        "b1": 0.05 * jax.random.normal(ks[1], (mid_ch,), jnp.float32),
        "g1": 1.0 + 0.1 * jax.random.normal(ks[2], (mid_ch,), jnp.float32),
        "bt1": 0.05 * jax.random.normal(ks[3], (mid_ch,), jnp.float32),
        "w2": 0.1 * jax.random.normal(ks[4], (3, 3, 3, mid_ch, out_ch), jnp.float32),
        "b2": 0.05 * jax.random.normal(ks[5], (out_ch,), jnp.float32),
        "g2": 1.0 + 0.1 * jax.random.normal(ks[6], (out_ch,), jnp.float32),
        "bt2": 0.05 * jax.random.normal(ks[7], (out_ch,), jnp.float32),
    }


if __name__ == "__main__":
    key = jax.random.PRNGKey(0)
    k_x, k_p = jax.random.split(key)

    N, C_in, C_mid, C_out = 2, 4, 8, 8
    D = H = W = 16                        # W * C = 128 -> lane-dense stores
    x = jax.random.normal(k_x, (N, C_in, D, H, W), jnp.float32)
    params = init_params(k_p, C_in, C_mid, C_out)

    out = jax.block_until_ready(double_conv(x, params))
    ref = jax.block_until_ready(double_conv_ref(x, params))

    assert out.shape == (N, C_out, D, H, W), out.shape
    max_err = float(jnp.max(jnp.abs(out - ref)))
    # bf16 MXU operands + bf16 intermediate activations (per perf review)
    # compared against an f32 reference -> relaxed tolerance.
    assert jnp.allclose(out, ref, atol=6e-2, rtol=3e-2), max_err

    print("KERNEL_OK")
</pallas_src>

<mosaic_0001>
module attributes {stable_mosaic.version = 11 : i64} {
  func.func @_conv_banded_kernel(%arg0: i32, %arg1: i32, %arg2: memref<1x18x18x72xbf16, #tpu.memory_space<vmem>>, %arg3: memref<648x128xbf16, #tpu.memory_space<vmem>>, %arg4: memref<1x128xf32, #tpu.memory_space<vmem>>, %arg5: memref<1x16x16x128xbf16, #tpu.memory_space<vmem>>, %arg6: memref<1x1x2x128xf32, #tpu.memory_space<vmem>>) attributes {dimension_semantics = [#tpu.dimension_semantics<parallel>, #tpu.dimension_semantics<parallel>], iteration_bounds = array<i64: 2, 1>, scalar_prefetch = 0 : i64, scratch_operands = 0 : i64, tpu.core_type = #tpu.core_type<tc>, window_params = [{transform_indices = @transform_0, window_bounds = array<i64: 1, 18, 18, 72>}, {pipeline_mode = #tpu.pipeline_mode<synchronous>, transform_indices = @transform_1, window_bounds = array<i64: 648, 128>}, {pipeline_mode = #tpu.pipeline_mode<synchronous>, transform_indices = @transform_2, window_bounds = array<i64: 1, 128>}, {transform_indices = @transform_3, window_bounds = array<i64: 1, 16, 16, 128>}, {transform_indices = @transform_4, window_bounds = array<i64: 1, 1, 2, 128>}]} {
    %c0 = arith.constant 0 : index
    %c0_0 = arith.constant 0 : index
    %c0_1 = arith.constant 0 : index
    %c0_2 = arith.constant 0 : index
    %0 = vector.load %arg2[%c0, %c0_0, %c0_1, %c0_2] : memref<1x18x18x72xbf16, #tpu.memory_space<vmem>>, vector<1x18x18x72xbf16>
    %1 = vector.shape_cast %0 : vector<1x18x18x72xbf16> to vector<18x18x72xbf16>
    %2 = vector.extract_strided_slice %1 {offsets = [0, 0, 0], sizes = [16, 16, 72], strides = [1, 1, 1]} : vector<18x18x72xbf16> to vector<16x16x72xbf16>
    %3 = vector.extract_strided_slice %1 {offsets = [0, 1, 0], sizes = [16, 16, 72], strides = [1, 1, 1]} : vector<18x18x72xbf16> to vector<16x16x72xbf16>
    %4 = vector.extract_strided_slice %1 {offsets = [0, 2, 0], sizes = [16, 16, 72], strides = [1, 1, 1]} : vector<18x18x72xbf16> to vector<16x16x72xbf16>
    %5 = vector.extract_strided_slice %1 {offsets = [1, 0, 0], sizes = [16, 16, 72], strides = [1, 1, 1]} : vector<18x18x72xbf16> to vector<16x16x72xbf16>
    %6 = vector.extract_strided_slice %1 {offsets = [1, 1, 0], sizes = [16, 16, 72], strides = [1, 1, 1]} : vector<18x18x72xbf16> to vector<16x16x72xbf16>
    %7 = vector.extract_strided_slice %1 {offsets = [1, 2, 0], sizes = [16, 16, 72], strides = [1, 1, 1]} : vector<18x18x72xbf16> to vector<16x16x72xbf16>
    %8 = vector.extract_strided_slice %1 {offsets = [2, 0, 0], sizes = [16, 16, 72], strides = [1, 1, 1]} : vector<18x18x72xbf16> to vector<16x16x72xbf16>
    %9 = vector.extract_strided_slice %1 {offsets = [2, 1, 0], sizes = [16, 16, 72], strides = [1, 1, 1]} : vector<18x18x72xbf16> to vector<16x16x72xbf16>
    %10 = vector.extract_strided_slice %1 {offsets = [2, 2, 0], sizes = [16, 16, 72], strides = [1, 1, 1]} : vector<18x18x72xbf16> to vector<16x16x72xbf16>
    %11 = tpu.concatenate %2, %3, %4, %5, %6, %7, %8, %9, %10 in 2 : vector<16x16x72xbf16>, vector<16x16x72xbf16>, vector<16x16x72xbf16>, vector<16x16x72xbf16>, vector<16x16x72xbf16>, vector<16x16x72xbf16>, vector<16x16x72xbf16>, vector<16x16x72xbf16>, vector<16x16x72xbf16> -> vector<16x16x648xbf16>
    %12 = vector.shape_cast %11 : vector<16x16x648xbf16> to vector<256x648xbf16>
    %c0_3 = arith.constant 0 : index
    %c0_4 = arith.constant 0 : index
    %13 = vector.load %arg3[%c0_3, %c0_4] : memref<648x128xbf16, #tpu.memory_space<vmem>>, vector<648x128xbf16>
    %cst = arith.constant dense<0.000000e+00> : vector<256x128xf32>
    %14 = tpu.matmul %12, %13, %cst {dimension_numbers = #tpu.dot_dimension_numbers<[1], [0], [0], [1], [0, 0, 1, 1], [], []>} : vector<256x648xbf16>, vector<648x128xbf16>, vector<256x128xf32> -> vector<256x128xf32>
    %c0_5 = arith.constant 0 : index
    %c0_6 = arith.constant 0 : index
    %15 = vector.load %arg4[%c0_5, %c0_6] : memref<1x128xf32, #tpu.memory_space<vmem>>, vector<1x128xf32>
    %16 = vector.broadcast %15 : vector<1x128xf32> to vector<256x128xf32>
    %17 = arith.addf %14, %16 : vector<256x128xf32>
    %18 = vector.shape_cast %17 : vector<256x128xf32> to vector<1x16x16x128xf32>
    %19 = arith.truncf %18 : vector<1x16x16x128xf32> to vector<1x16x16x128xbf16>
    %c0_7 = arith.constant 0 : index
    %c0_8 = arith.constant 0 : index
    %c0_9 = arith.constant 0 : index
    %c0_10 = arith.constant 0 : index
    %20 = vector.load %arg5[%c0_7, %c0_8, %c0_9, %c0_10] : memref<1x16x16x128xbf16, #tpu.memory_space<vmem>>, vector<1x16x16x128xbf16>
    tpu.vector_store %arg5[%c0_7, %c0_8, %c0_9, %c0_10], %19 {strides = array<i32>} : memref<1x16x16x128xbf16, #tpu.memory_space<vmem>>, vector<1x16x16x128xbf16>,
    %cst_11 = arith.constant dense<0.000000e+00> : vector<128xf32>
    %21 = vector.multi_reduction <add>, %17, %cst_11 [0] : vector<256x128xf32> to vector<128xf32>
    %22 = vector.shape_cast %21 : vector<128xf32> to vector<1x128xf32>
    %23 = arith.mulf %17, %17 : vector<256x128xf32>
    %cst_12 = arith.constant dense<0.000000e+00> : vector<128xf32>
    %24 = vector.multi_reduction <add>, %23, %cst_12 [0] : vector<256x128xf32> to vector<128xf32>
    %25 = vector.shape_cast %24 : vector<128xf32> to vector<1x128xf32>
    %26 = tpu.concatenate %22, %25 in 0 : vector<1x128xf32>, vector<1x128xf32> -> vector<2x128xf32>
    %27 = vector.shape_cast %26 : vector<2x128xf32> to vector<1x1x2x128xf32>
    %c0_13 = arith.constant 0 : index
    %c0_14 = arith.constant 0 : index
    %c0_15 = arith.constant 0 : index
    %c0_16 = arith.constant 0 : index
    %28 = vector.load %arg6[%c0_13, %c0_14, %c0_15, %c0_16] : memref<1x1x2x128xf32, #tpu.memory_space<vmem>>, vector<1x1x2x128xf32>
    tpu.vector_store %arg6[%c0_13, %c0_14, %c0_15, %c0_16], %27 {strides = array<i32>} : memref<1x1x2x128xf32, #tpu.memory_space<vmem>>, vector<1x1x2x128xf32>,
    return
  }
  func.func @transform_0(%arg0: i32, %arg1: i32) -> (i32, i32, i32, i32) {
    %c0_i32 = arith.constant 0 : i32
    %c0_i32_0 = arith.constant 0 : i32
    %c0_i32_1 = arith.constant 0 : i32
    %c0_i32_2 = arith.constant 0 : i32
    return %arg0, %c0_i32, %c0_i32_0, %c0_i32_1 : i32, i32, i32, i32
  }
  func.func @transform_1(%arg0: i32, %arg1: i32) -> (i32, i32) {
    %c0_i32 = arith.constant 0 : i32
    %c0_i32_0 = arith.constant 0 : i32
    %c0_i32_1 = arith.constant 0 : i32
    return %c0_i32, %c0_i32_0 : i32, i32
  }
  func.func @transform_2(%arg0: i32, %arg1: i32) -> (i32, i32) {
    %c0_i32 = arith.constant 0 : i32
    %c0_i32_0 = arith.constant 0 : i32
    %c0_i32_1 = arith.constant 0 : i32
    return %c0_i32, %c0_i32_0 : i32, i32
  }
  func.func @transform_3(%arg0: i32, %arg1: i32) -> (i32, i32, i32, i32) {
    %c0_i32 = arith.constant 0 : i32
    %c0_i32_0 = arith.constant 0 : i32
    %c0_i32_1 = arith.constant 0 : i32
    return %arg0, %arg1, %c0_i32, %c0_i32_0 : i32, i32, i32, i32
  }
  func.func @transform_4(%arg0: i32, %arg1: i32) -> (i32, i32, i32, i32) {
    %c0_i32 = arith.constant 0 : i32
    %c0_i32_0 = arith.constant 0 : i32
    %c0_i32_1 = arith.constant 0 : i32
    return %arg0, %arg1, %c0_i32, %c0_i32_0 : i32, i32, i32, i32
  }
}

</mosaic_0001>

<bundles_post_ra>
// kernel: tpu_custom_call.1
= control target key start
LH: loop header
LB: loop body
LE: loop exit
PB: predicated region body
PF: predicated region fallthrough
CT: control target
= control target key end

     0   :  { %10 = vsyncpa [#allocation3], 0  ;;  %s4510_s0 = inlined_call_operand.vmem [shape: bf16[2,18,18,72], index: 0, kind: input, shape index: {}]   ;;  %s4511_s1 = inlined_call_operand.vmem [shape: bf16[648,128], index: 1, kind: input, shape index: {}]   ;;  %s4512_s2 = inlined_call_operand.vmem [shape: f32[1,128], index: 2, kind: input, shape index: {}]   ;;  %s4513_s3 = inlined_call_operand.hbm [shape: bf16[2,16,16,128], index: 3, kind: output, shape index: {0}]   ;;  %s4514_s4 = inlined_call_operand.hbm [shape: f32[2,1,2,128], index: 4, kind: output, shape index: {1}]  }
   0x1   :  { %12 = vsyncpa [#allocation3 + $0x1], 0 }
   0x2   :  { %13 = vsyncpa [#allocation5], 0 }
   0x3   :  { %15 = vsyncpa [#allocation5 + $0x1], 0  ;;  %s3367_s15 = smov 0   ;;  %s3369_s16 = smov 0  }
   0x4   :  { %s3371_s17 = smov 0   ;;  %s3373_s18 = smov 0  }
   0x5   :  { %s3375_s19 = smov 0   ;;  %s3377_s20 = smov 0  }
   0x6 LB: > { %s2557_s21 = sadd.s32 4294967295, %s3328_s20   ;;  %s2558_s22 = sadd.s32 4294967294, %s3328_s20   ;;  %s3328_s20 = sphi %s3377_s20, %s21_s20   ;;  %s3324_s19 = sphi %s3375_s19, %s4521_s19   ;;  %s3320_s18 = sphi %s3373_s18, %s4520_s18   ;;  %s3316_s17 = sphi %s3371_s17, %s4519_s17   ;;  %s3312_s16 = sphi %s3369_s16, %s4518_s16   ;;  %s3308_s15 = sphi %s3367_s15, %s4517_s15  }
   0x7   : > { %s33_s23 = sadd.s32 1, %s3324_s19  ;;  %s110_s24 = sadd.s32 1, %s3316_s17 }
   0x8   : > { %p35_p0 = scmp.ge.s32.totalorder %s33_s23, 2  ;;  %p120_p1 = scmp.ne.s32.totalorder %s3316_s17, %s3312_s16 }
   0x9   : > { %p121_p2 = scmp.eq.s32.totalorder %s2557_s21, 1  ;;  %p126_p3 = scmp.ne.s32.totalorder %s3312_s16, %s3308_s15 }
   0xa   : > { %s4523_s23 = smov (%p35_p0, %s33_s23), 0  ;;  %p127_p5 = scmp.eq.s32.totalorder %s2558_s22, 1 }
   0xb   : > { %p3407_p4 = por %p121_p2, %p120_p1  ;;  %s105_s26 = ssub.s32 %s3324_s19, %s4523_s23 }
   0xc   : > { %p2561_p6 = scmp.ge.s32.totalorder %s3328_s20, 1  ;;  %p108_p7 = scmp.eq.s32.totalorder %s105_s26, 0 }
   0xd   : > { %p3414_p8 = por %p127_p5, %p126_p3  ;;  %p187_p9 = scmp.lt.s32.totalorder %s3328_s20, 3 }
   0xe   : > { %s3420_s28 = scalar_select %p108_p7, %s3316_s17, %s110_s24  }
   0xf   : > { %p188_p10 = pnand %p2561_p6, %p187_p9 }
  0x10   : > { %p218_p11 = scmp.lt.s32.totalorder (!%p188_p10), %s3320_s18, 1  ;;  %v3170_v0 = vld [vmem:[%s4511_s1 + $0x40] sm:$0xff] (!%p188_p10)   ;;  %v3172_v2 = vld [vmem:[%s4511_s1 + $0x48] sm:$0xff] (!%p188_p10)   ;;  %v3174_v4 = vld [vmem:[%s4511_s1 + $0x50] sm:$0xff] (!%p188_p10)   ;;  %vm632_vm0 = vcmask (!%p188_p10), 1046528   ;;  %s3330_s26 = smov (!%p188_p10), 88  }
  0x11   : > { %191 = sbr.rel (%p188_p10) target bundleno = 663 (0x297), region = 32  ;;  %2826 = vmatprep.subr.bf16.mxu0 (!%p188_p10), %v3170_v0  ;;  %3050 = vmatprep.subr.bf16.mxu1 (!%p188_p10), %v3170_v0  ;;  %v3171_v1 = vld [vmem:[%s4511_s1] sm:$0xff] (!%p188_p10)   ;;  %v3173_v3 = vld [vmem:[%s4511_s1 + $0x8] sm:$0xff] (!%p188_p10)   ;;  %vm407_vm1 = vsmask.f32 (!%p188_p10), 7424  ;;  %s3331_s29 = smov (!%p188_p10), 16  }
  0x12   : > { %2827 = vmatpush3.bf16.msra.mxu0 (!%p188_p10), %v3171_v1  ;;  %3058 = vmatpush3.bf16.msra.mxu1 (!%p188_p10), %v3171_v1  ;;  %s3332_s30 = smov (!%p188_p10), 72   ;;  %s3335_s6 = smov (!%p188_p10), 104   ;;  %vm1000_vm2 = vcmask (!%p188_p10), 130048   ;;  %vm1033_vm3 = vcmask (!%p188_p10), 719872   ;;  %vm951_vm4 = vcmask (!%p188_p10), 588800   ;;  %vm1659_vm5 = vcmask (!%p188_p10), 1043456  }
  0x13   : > { %2828 = vmatprep.subr.bf16.mxu0 (!%p188_p10), %v3172_v2  ;;  %3051 = vmatprep.subr.bf16.mxu1 (!%p188_p10), %v3172_v2  ;;  %s3337_s7 = smov (!%p188_p10), 32   ;;  %vm1164_vm6 = vcmask (!%p188_p10), 392192   ;;  %vm1197_vm7 = vcmask (!%p188_p10), 982016   ;;  %vm1082_vm8 = vcmask (!%p188_p10), 261120   ;;  %vm1115_vm9 = vcmask (!%p188_p10), 850944   ;;  %s2730_s22 = sshll.u32 (!%p188_p10), %s3320_s18, 11 }
  0x14   : > { %vm1246_vm10 = vcmask (!%p188_p10), 523264   ;;  %vm1626_vm11 = vcmask (!%p188_p10), 64512   ;;  %s4426_s9 = scalar_lea.hbm (!%p188_p10), %s4513_s3, %s2730_s22  ;;  %s3339_s12 = smov (!%p188_p10), [#allocation2]  }
  0x15   : > { %s3222_s13 = sshll.u32 (!%p188_p10), %s3339_s12, 4  ;;  %s3223_s13 = int_to_ptr.vmem [resolvable:$false] %s3222_s13 }
  0x16   : > { %2829 = vmatpush3.bf16.msra.mxu0 (!%p188_p10), %v3173_v3  ;;  %3059 = vmatpush3.bf16.msra.mxu1 (!%p188_p10), %v3173_v3  ;;  %s3224_s14 = scalar_lea.vmem (!%p188_p10), %s3223_s13, 4096 }
  0x17   : > { %2830 = vmatprep.subr.bf16.mxu0 (!%p188_p10), %v3174_v4  ;;  %3052 = vmatprep.subr.bf16.mxu1 (!%p188_p10), %v3174_v4 }
  0x18   : > { %s219_s5 = scalar_select %p218_p11, %s3320_s18, 1 }
  0x1a   : > { %s3066_s8 = smul.u32 216, %s219_s5  ;;  %s3334_s5 = smov 48  }
  0x1c   : > { %s3439_s21 = scalar_lea.vmem %s4510_s0, %s3066_s8 }
  0x1d   : > { %v3445_v5 = vld [vmem:[%s3439_s21 + $0x78] sm:$0xff]   ;;  %v3448_v6 = vld [vmem:[%s3439_s21 + $0x6c] sm:$0xff]   ;;  %v3455_v7 = vld [vmem:[%s3439_s21 + $0x60] sm:$0xff]  }
  0x1e   : > { %736 = vrot.lane.b32.xlu0 %v3445_v5, %s3330_s26  ;;  %734 = vrot.lane.b32.xlu1 %v3448_v6, %s3330_s26  ;;  %v3140_v8 = vld [vmem:[%s3439_s21 + $0x68] ss:$0 sps:$4 sm:$0x11]   ;;  %v3459_v9 = vld [vmem:[%s3439_s21 + $0xc] sm:$0xff]   ;;  %v660_v10 = vrot.slane %v3448_v6, 1  ;;  %v657_v11 = vrot.slane %v3455_v7, 1 }
  0x1f   : > { %v658_v12 = vrot.slane %v3140_v8, 1  ;;  %v3142_v13 = vld [vmem:[%s3439_s21 + $0x74] ss:$0 sps:$4 sm:$0x11]   ;;  %v3465_v14 = vld [vmem:[%s3439_s21] sm:$0xff]   ;;  %v505_v19 = vshrl.u32 %v3455_v7, 16 }
  0x20   : > { %v661_v16 = vrot.slane %v3142_v13, 1  ;;  %v3144_v17 = vld [vmem:[%s3439_s21 + $0x8] ss:$0 sps:$4 sm:$0x11]   ;;  %v633_v18 = vrot.slane %v3465_v14, 1  ;;  %v507_v20 = vshll.u32 %v3455_v7, 16 }
  0x21   : > { %v3468_v15 = vsel %vm632_vm0, %v657_v11, %v658_v12  ;;  %v512_v21 = vshll.u32 %v3140_v8, 16  ;;  %v409_v22 = vshrl.u32 %v3465_v14, 16  ;;  %v411_v23 = vshll.u32 %v3465_v14, 16  ;;  %v3145_v28 = vld [vmem:[%s3439_s21 + $0x14] ss:$0 sps:$4 sm:$0x11]  }
  0x22   : > { %718 = vrot.lane.b32.xlu1 %v3459_v9, %s3330_s26  ;;  %697 = vrot.lane.b32.xlu0 %v3468_v15, %s3331_s29  ;;  %v3481_v24 = vsel %vm632_vm0, %v660_v10, %v661_v16  ;;  %v634_v25 = vrot.slane %v3144_v17, 1  ;;  %v416_v26 = vshll.u32 %v3144_v17, 16  ;;  %v517_v27 = vshrl.u32 %v3448_v6, 16  ;;  %v3493_v43 = vld [vmem:[%s3439_s21 + $0x18] sm:$0xff]   ;;  %v3524_v8 = vld [vmem:[%s3439_s21 + $0x84] sm:$0xff]  }
  0x23   : > { %v509_v29 = vrot.slane %v507_v20, 1  ;;  %v514_v30 = vrot.slane %v512_v21, 1  ;;  %v413_v31 = vrot.slane %v411_v23, 1  ;;  %v519_v32 = vshll.u32 %v3448_v6, 16 }
  0x24   : > { %v635_v33 = vsel %vm632_vm0, %v633_v18, %v634_v25  ;;  %v418_v34 = vrot.slane %v416_v26, 1  ;;  %v524_v35 = vshll.u32 %v3142_v13, 16  ;;  %v421_v36 = vshrl.u32 %v3459_v9, 16  ;;  %v3147_v48 = vld [vmem:[%s3439_s21 + $0x80] ss:$0 sps:$4 sm:$0x11]  }
  0x25   : > { %v510_v37 = vor.u32 %v509_v29, %v505_v19  ;;  %v414_v38 = vor.u32 %v413_v31, %v409_v22  ;;  %v521_v39 = vrot.slane %v519_v32, 1  ;;  %v423_v40 = vshll.u32 %v3459_v9, 16  ;;  %v3149_v55 = vld [vmem:[%s3439_s21 + $0x20] ss:$0 sps:$4 sm:$0x11]   ;;  %v3534_v13 = vld [vmem:[%s3439_s21 + $0x24] sm:$0xff]  }
  0x26   : > { %699 = vrot.lane.b32.xlu1 %v3481_v24, %s3331_s29  ;;  %681 = vrot.lane.b32.xlu0 %v635_v33, %s3331_s29  ;;  %v526_v41 = vrot.slane %v524_v35, 1  ;;  %v428_v42 = vshll.u32 %v3145_v28, 16  ;;  %v531_v50 = vshll.u32 %v3445_v5, 16  ;;  %v636_v52 = vrot.slane %v3459_v9, 1 }
  0x27   : > { %v3496_v44 = vsel %vm407_vm1, %v510_v37, %v514_v30  ;;  %v419_v45 = vsel %vm407_vm1, %v414_v38, %v418_v34  ;;  %v522_v46 = vor.u32 %v521_v39, %v517_v27  ;;  %v425_v47 = vrot.slane %v423_v40, 1  ;;  %v3151_v17 = vld [vmem:[%s3439_s21 + $0x8c] ss:$0 sps:$4 sm:$0x11]   ;;  %v3556_v30 = vld [vmem:[%s3439_s21 + $0x90] sm:$0xff]  }
  0x28   : > { %v430_v49 = vrot.slane %v428_v42, 1  ;;  %v637_v53 = vrot.slane %v3145_v28, 1  ;;  %v529_v54 = vshrl.u32 %v3445_v5, 16  ;;  %v533_v57 = vrot.slane %v531_v50, 1 }
  0x29   : > { %v426_v51 = vor.u32 %v425_v47, %v421_v36  ;;  %v3508_v56 = vsel %vm407_vm1, %v522_v46, %v526_v41  ;;  %v536_v58 = vshll.u32 %v3147_v48, 16  ;;  %v435_v59 = vshll.u32 %v3493_v43, 16  ;;  %v3153_v23 = vld [vmem:[%s3439_s21 + $0x2c] ss:$0 sps:$4 sm:$0x11]   ;;  %v3573_v41 = vld [vmem:[%s3439_s21 + $0x30] sm:$0xff]  }
  0x2a   : > { %600 = vrot.lane.b32.xlu1 %v419_v45, %s3332_s30  ;;  %616 = vrot.lane.b32.xlu0 %v3496_v44, %s3332_s30  ;;  %v663_v61 = vrot.slane %v3445_v5, 1  ;;  %v664_v62 = vrot.slane %v3147_v48, 1  ;;  %v433_v63 = vshrl.u32 %v3493_v43, 16  ;;  %v440_v1 = vshll.u32 %v3149_v55, 16  ;;  %v3583_v47 = vld [vmem:[%s3439_s21 + $0x9c] sm:$0xff]  }
  0x2b   : > { %v3512_v60 = vsel %vm407_vm1, %v426_v51, %v430_v49  ;;  %v437_v0 = vrot.slane %v435_v59, 1  ;;  %v3521_v2 = vsel %vm632_vm0, %v636_v52, %v637_v53  ;;  %v534_v3 = vor.u32 %v533_v57, %v529_v54  ;;  %v3155_v37 = vld [vmem:[%s3439_s21 + $0x98] ss:$0 sps:$4 sm:$0x11]  }
  0x2c   : > { %v538_v4 = vrot.slane %v536_v58, 1  ;;  %v3531_v10 = vsel %vm632_vm0, %v663_v61, %v664_v62  ;;  %v442_v12 = vrot.slane %v440_v1, 1  ;;  %v543_v18 = vshll.u32 %v3524_v8, 16  ;;  %v3580_v46 = vld [vmem:[%s3439_s21 + $0x38] ss:$0 sps:$4 sm:$0x11]  }
  0x2d   : > { %v438_v11 = vor.u32 %v437_v0, %v433_v63  ;;  %v639_v19 = vrot.slane %v3493_v43, 1  ;;  %v640_v21 = vrot.slane %v3149_v55, 1  ;;  %v541_v22 = vshrl.u32 %v3524_v8, 16  ;;  %v3598_v58 = vld [vmem:[%s3439_s21 + $0xa4] ss:$0 sps:$4 sm:$0x11]  }
  0x2e   : > { %602 = vrot.lane.b32.xlu1 %v3512_v60, %s3332_s30  ;;  %618 = vrot.lane.b32.xlu0 %v3508_v56, %s3332_s30  ;;  %v3537_v16 = vsel %vm407_vm1, %v534_v3, %v538_v4  ;;  %v447_v25 = vshll.u32 %v3534_v13, 16  ;;  %v545_v26 = vrot.slane %v543_v18, 1  ;;  %v548_v27 = vshll.u32 %v3151_v17, 16  ;;  %v3615_v18 = vld [vmem:[%s3439_s21 + $0x3c] sm:$0xff]  }
  0x2f   : > { %v3547_v20 = vsel %vm407_vm1, %v438_v11, %v442_v12  ;;  %v666_v28 = vrot.slane %v3524_v8, 1  ;;  %v667_v29 = vrot.slane %v3151_v17, 1  ;;  %v445_v31 = vshrl.u32 %v3534_v13, 16  ;;  %v3175_v11 = vld [vmem:[%s4511_s1 + $0x10] sm:$0xff]  }
  0x30   : > { %v449_v32 = vrot.slane %v447_v25, 1  ;;  %v452_v33 = vshll.u32 %v3153_v23, 16  ;;  %v3562_v34 = vsel %vm632_vm0, %v639_v19, %v640_v21  ;;  %v546_v35 = vor.u32 %v545_v26, %v541_v22  ;;  %v3176_v22 = vld [vmem:[%s4511_s1 + $0x58] sm:$0xff]   ;;  %2831 = vmatpush3.bf16.msra.mxu0 %v3175_v11  ;;  %3060 = vmatpush3.bf16.msra.mxu1 %v3175_v11 }
  0x31   : > { %v550_v36 = vrot.slane %v548_v27, 1  ;;  %v3570_v38 = vsel %vm632_vm0, %v666_v28, %v667_v29  ;;  %v555_v42 = vshll.u32 %v3556_v30, 16  ;;  %v642_v48 = vrot.slane %v3534_v13, 1  ;;  %v3177_v25 = vld [vmem:[%s4511_s1 + $0x18] sm:$0xff]   ;;  %v3630_v28 = vld [vmem:[%s3439_s21 + $0xa8] sm:$0xff]   ;;  %2832 = vmatprep.subr.bf16.mxu0 %v3176_v22  ;;  %3053 = vmatprep.subr.bf16.mxu1 %v3176_v22 }
  0x32   : > { %720 = vrot.lane.b32.xlu1 %v3493_v43, %s3330_s26  ;;  %683 = vrot.lane.b32.xlu0 %v3521_v2, %s3331_s29  ;;  %v450_v39 = vor.u32 %v449_v32, %v445_v31  ;;  %v454_v40 = vrot.slane %v452_v33, 1  ;;  %v643_v49 = vrot.slane %v3153_v23, 1  ;;  %v553_v50 = vshrl.u32 %v3556_v30, 16  ;;  %v3178_v31 = vld [vmem:[%s4511_s1 + $0x60] sm:$0xff]   ;;  %v3184_v22 = vld [vmem:[%s4511_s1 + $0x78] sm:$0xff]  }
  0x33   : > { %v3577_v45 = vsel %vm407_vm1, %v546_v35, %v550_v36  ;;  %v560_v51 = vshll.u32 %v3155_v37, 16  ;;  %v557_v53 = vrot.slane %v555_v42, 1  ;;  %v459_v54 = vshll.u32 %v3573_v41, 16  ;;  %v3642_v35 = vld [vmem:[%s3439_s21 + $0x44] ss:$0 sps:$4 sm:$0x11]  }
  0x34   : > { %v3592_v52 = vsel %vm407_vm1, %v450_v39, %v454_v40  ;;  %v464_v55 = vshll.u32 %v3580_v46, 16  ;;  %v669_v57 = vrot.slane %v3556_v30, 1  ;;  %v567_v59 = vshll.u32 %v3583_v47, 16  ;;  %v3179_v39 = vld [vmem:[%s4511_s1 + $0x20] sm:$0xff]   ;;  %2833 = vmatpush3.bf16.msra.mxu0 %v3177_v25  ;;  %3061 = vmatpush3.bf16.msra.mxu1 %v3177_v25  ;;  %v3180_v42 = vld [vmem:[%s4511_s1 + $0x68] sm:$0xff]  }
  0x35   : > { %v3604_v61 = vsel %vm632_vm0, %v642_v48, %v643_v49  ;;  %v670_v62 = vrot.slane %v3155_v37, 1  ;;  %v457_v63 = vshrl.u32 %v3573_v41, 16  ;;  %v558_v0 = vor.u32 %v557_v53, %v553_v50  ;;  %2834 = vmatprep.subr.bf16.mxu0 %v3178_v31  ;;  %3054 = vmatprep.subr.bf16.mxu1 %v3178_v31 }
  0x36   : > { %701 = vrot.lane.b32.xlu1 %v3531_v10, %s3331_s29  ;;  %620 = vrot.lane.b32.xlu0 %v3537_v16, %s3332_s30  ;;  %v562_v1 = vrot.slane %v560_v51, 1  ;;  %v461_v3 = vrot.slane %v459_v54, 1  ;;  %v645_v4 = vrot.slane %v3573_v41, 1  ;;  %v466_v12 = vrot.slane %v464_v55, 1  ;;  %v3181_v55 = vld [vmem:[%s4511_s1 + $0x28] sm:$0xff]  }
  0x37   : > { %v646_v17 = vrot.slane %v3580_v46, 1  ;;  %v565_v19 = vshrl.u32 %v3583_v47, 16  ;;  %v672_v21 = vrot.slane %v3583_v47, 1  ;;  %v569_v23 = vrot.slane %v567_v59, 1  ;;  %v3182_v59 = vld [vmem:[%s4511_s1 + $0x70] sm:$0xff]  }
  0x38   : > { %v572_v26 = vshll.u32 %v3598_v58, 16  ;;  %v673_v27 = vrot.slane %v3598_v58, 1  ;;  %v469_v29 = vshrl.u32 %v3615_v18, 16  ;;  %v3639_v32 = vsel %vm632_vm0, %v669_v57, %v670_v62  ;;  %v3666_v54 = vld [vmem:[%s3439_s21 + $0xb0] ss:$0 sps:$4 sm:$0x11]   ;;  %2835 = vmatpush3.bf16.msra.mxu0 %v3179_v39  ;;  %3062 = vmatpush3.bf16.msra.mxu1 %v3179_v39 }
  0x39   : > { %v462_v33 = vor.u32 %v461_v3, %v457_v63  ;;  %v3645_v36 = vsel %vm407_vm1, %v558_v0, %v562_v1  ;;  %v471_v37 = vshll.u32 %v3615_v18, 16  ;;  %v648_v40 = vrot.slane %v3615_v18, 1  ;;  %v3675_v58 = vld [vmem:[%s3439_s21 + $0x48] sm:$0xff]   ;;  %2836 = vmatprep.subr.bf16.mxu0 %v3180_v42  ;;  %3055 = vmatprep.subr.bf16.mxu1 %v3180_v42  ;;  %v3183_v63 = vld [vmem:[%s4511_s1 + $0x30] sm:$0xff]  }
  0x3a   : > { %604 = vrot.lane.b32.xlu1 %v3547_v20, %s3332_s30  ;;  %738 = vrot.lane.b32.xlu0 %v3524_v8, %s3330_s26  ;;  %v574_v48 = vrot.slane %v572_v26, 1  ;;  %v577_v49 = vshrl.u32 %v3630_v28, 16  ;;  %v579_v51 = vshll.u32 %v3630_v28, 16  ;;  %v476_v53 = vshll.u32 %v3642_v35, 16  ;;  %v3710_v26 = vld [vmem:[%s3439_s21 + $0xb4] sm:$0xff]  }
  0x3b   : > { %v3660_v46 = vsel %vm407_vm1, %v462_v33, %v466_v12  ;;  %v473_v50 = vrot.slane %v471_v37, 1  ;;  %v649_v57 = vrot.slane %v3642_v35, 1  ;;  %v675_v62 = vrot.slane %v3630_v28, 1 }
  0x3c   : > { %v3687_v0 = vsel %vm632_vm0, %v645_v4, %v646_v17  ;;  %v570_v1 = vor.u32 %v569_v23, %v565_v19  ;;  %2837 = vmatpush3.bf16.msra.mxu0 %v3181_v55  ;;  %3063 = vmatpush3.bf16.msra.mxu1 %v3181_v55  ;;  %v478_v3 = vrot.slane %v476_v53, 1  ;;  %v581_v11 = vrot.slane %v579_v51, 1  ;;  %v3185_v23 = vld [vmem:[%s4511_s1 + $0x38] sm:$0xff]  }
  0x3d   : > { %v481_v12 = vshrl.u32 %v3675_v58, 16  ;;  %2838 = vmatprep.subr.bf16.mxu0 %v3182_v59  ;;  %v3698_v4 = vsel %vm632_vm0, %v672_v21, %v673_v27  ;;  %v474_v17 = vor.u32 %v473_v50, %v469_v29  ;;  %v584_v19 = vshll.u32 %v3666_v54, 16  ;;  %3056 = vmatprep.subr.bf16.mxu1 %v3182_v59  ;;  %v3165_v21 = vld [vmem:[%s3439_s21 + $0x50] ss:$0 sps:$4 sm:$0x11]   ;;  %v3186_v27 = vld [vmem:[%s4511_s1 + $0xc0] sm:$0xff]  }
  0x3e   : > { %722 = vrot.lane.b32.xlu1 %v3534_v13, %s3330_s26  ;;  %685 = vrot.lane.b32.xlu0 %v3562_v34, %s3331_s29  ;;  %v3705_v25 = vsel %vm407_vm1, %v570_v1, %v574_v48  ;;  %v483_v31 = vshll.u32 %v3675_v58, 16  ;;  %v676_v35 = vrot.slane %v3666_v54, 1  ;;  %v651_v37 = vrot.slane %v3675_v58, 1  ;;  %v3736_v54 = vld [vmem:[%s3439_s21 + $0x54] sm:$0xff]  }
  0x3f   : > { %v3719_v29 = vsel %vm407_vm1, %v474_v17, %v478_v3  ;;  %v586_v33 = vrot.slane %v584_v19, 1  ;;  %v589_v39 = vshrl.u32 %v3710_v26, 16  ;;  %v488_v48 = vshll.u32 %v3165_v21, 16  ;;  %v3167_v55 = vld [vmem:[%s3439_s21 + $0xbc] ss:$0 sps:$4 sm:$0x11]  }
  0x40   : > { %2839 = vmatpush3.bf16.msra.mxu0 %v3183_v63  ;;  %3064 = vmatpush3.bf16.msra.mxu1 %v3183_v63  ;;  %v485_v42 = vrot.slane %v483_v31, 1  ;;  %v3333_v50 = vmov 0   ;;  %v3733_v51 = vsel %vm632_vm0, %v648_v40, %v649_v57  ;;  %v582_v53 = vor.u32 %v581_v11, %v577_v49  ;;  %v3169_v57 = vld [vmem:[%s3439_s21 + $0x5c] ss:$0 sps:$4 sm:$0x11]  }
  0x41   : > { %2840 = vmatprep.subr.bf16.mxu0 %v3184_v22  ;;  %3057 = vmatprep.subr.bf16.mxu1 %v3184_v22  ;;  %v591_v59 = vshll.u32 %v3710_v26, 16  ;;  %v3745_v63 = vsel %vm632_vm0, %v675_v62, %v676_v35  ;;  %v490_v3 = vrot.slane %v488_v48, 1  ;;  %v652_v22 = vrot.slane %v3165_v21, 1 }
  0x42   : > { %703 = vrot.lane.b32.xlu1 %v3570_v38, %s3331_s29  ;;  %622 = vrot.lane.b32.xlu0 %v3577_v45, %s3332_s30  ;;  %v486_v1 = vor.u32 %v485_v42, %v481_v12  ;;  %v3748_v40 = vsel %vm407_vm1, %v582_v53, %v586_v33  ;;  %v596_v17 = vshll.u32 %v3167_v55, 16  ;;  %v495_v62 = vshll.u32 %v3736_v54, 16 }
  0x43   : > { %v593_v49 = vrot.slane %v591_v59, 1  ;;  %v678_v12 = vrot.slane %v3710_v26, 1  ;;  %v679_v19 = vrot.slane %v3167_v55, 1  ;;  %v3766_v31 = vsel %vm632_vm0, %v651_v37, %v652_v22  ;;  %v3783_v37 = vld [vmem:[%s3439_s21 + $0xc0] sm:$0xff]  }
  0x44   : > { %2841 = vmatpush3.bf16.msra.mxu0 %v3185_v23  ;;  %3065 = vmatpush3.bf16.msra.mxu1 %v3185_v23  ;;  %v3756_v11 = vsel %vm407_vm1, %v486_v1, %v490_v3  ;;  %v493_v23 = vshrl.u32 %v3736_v54, 16  ;;  %v497_v21 = vrot.slane %v495_v62, 1  ;;  %v598_v35 = vrot.slane %v596_v17, 1 }
  0x45   : > { %2938 = vmatprep.subr.bf16.mxu1 %v3186_v27  ;;  %1985 = vmatprep.subr.bf16.mxu0 %v3333_v50  ;;  %v500_v27 = vshll.u32 %v3169_v57, 16  ;;  %v594_v33 = vor.u32 %v593_v49, %v589_v39  ;;  %v3773_v42 = vsel %vm632_vm0, %v678_v12, %v679_v19  ;;  %v654_v59 = vrot.slane %v3736_v54, 1  ;;  %v3187_v19 = vld [vmem:[%s4511_s1 + $0x80] sm:$0xff]  }
  0x46   : > { %606 = vrot.lane.b32.xlu1 %v3592_v52, %s3332_s30  ;;  %740 = vrot.lane.b32.xlu0 %v3556_v30, %s3330_s26  ;;  %v498_v48 = vor.u32 %v497_v21, %v493_v23  ;;  %v655_v1 = vrot.slane %v3169_v57, 1  ;;  %v3189_v21 = vld [vmem:[%s4511_s1 + $0xc8] sm:$0xff]  }
  0x47   : > { %v502_v53 = vrot.slane %v500_v27, 1  ;;  %v3776_v55 = vsel %vm407_vm1, %v594_v33, %v598_v35  ;;  %v3190_v33 = vld [vmem:[%s4511_s1 + $0x108] sm:$0xff]  }
  0x48   : > { %v3794_v3 = vsel %vm632_vm0, %v654_v59, %v655_v1  ;;  %v3192_v59 = vld [vmem:[%s4511_s1 + $0xd0] sm:$0xff]  }
  0x49   : > { %v3786_v39 = vsel %vm407_vm1, %v498_v48, %v502_v53 }
  0x4a   : > { %724 = vrot.lane.b32.xlu1 %v3573_v41, %s3330_s26  ;;  %687 = vrot.lane.b32.xlu0 %v3604_v61, %s3331_s29 }
  0x4e   : > { %705 = vrot.lane.b32.xlu1 %v3639_v32, %s3331_s29  ;;  %624 = vrot.lane.b32.xlu0 %v3645_v36, %s3332_s30 }
  0x52   : > { %608 = vrot.lane.b32.xlu1 %v3660_v46, %s3332_s30  ;;  %742 = vrot.lane.b32.xlu0 %v3583_v47, %s3330_s26 }
  0x56   : > { %726 = vrot.lane.b32.xlu1 %v3615_v18, %s3330_s26  ;;  %689 = vrot.lane.b32.xlu0 %v3687_v0, %s3331_s29 }
  0x5a   : > { %707 = vrot.lane.b32.xlu1 %v3698_v4, %s3331_s29  ;;  %626 = vrot.lane.b32.xlu0 %v3705_v25, %s3332_s30 }
  0x5e   : > { %610 = vrot.lane.b32.xlu1 %v3719_v29, %s3332_s30  ;;  %744 = vrot.lane.b32.xlu0 %v3630_v28, %s3330_s26 }
  0x62   : > { %728 = vrot.lane.b32.xlu1 %v3675_v58, %s3330_s26  ;;  %691 = vrot.lane.b32.xlu0 %v3733_v51, %s3331_s29 }
  0x66   : > { %709 = vrot.lane.b32.xlu1 %v3745_v63, %s3331_s29  ;;  %628 = vrot.lane.b32.xlu0 %v3748_v40, %s3332_s30 }
  0x6a   : > { %612 = vrot.lane.b32.xlu1 %v3756_v11, %s3332_s30  ;;  %746 = vrot.lane.b32.xlu0 %v3710_v26, %s3330_s26 }
  0x6e   : > { %730 = vrot.lane.b32.xlu1 %v3736_v54, %s3330_s26  ;;  %693 = vrot.lane.b32.xlu0 %v3766_v31, %s3331_s29 }
  0x72   : > { %711 = vrot.lane.b32.xlu1 %v3773_v42, %s3331_s29  ;;  %630 = vrot.lane.b32.xlu0 %v3776_v55, %s3332_s30 }
  0x76   : > { %614 = vrot.lane.b32.xlu1 %v3786_v39, %s3332_s30  ;;  %748 = vrot.lane.b32.xlu0 %v3783_v37, %s3330_s26  ;;  %s3336_s30 = smov 120  }
  0x7a   : > { %732 = vrot.lane.b32.xlu1 %v3455_v7, %s3330_s26  ;;  %695 = vrot.lane.b32.xlu0 %v3794_v3, %s3331_s29  ;;  %s3338_s26 = smov 64  }
  0x7e   : > { %837 = vrot.lane.b32.xlu1 %v3493_v43, %s3334_s5  ;;  %800 = vrot.lane.b32.xlu0 %v3521_v2, %s3335_s6 }
  0x82   : > { %884 = vrot.lane.b32.xlu1 %v3547_v20, %s3336_s30  ;;  %765 = vrot.lane.b32.xlu0 %v3512_v60, %s3337_s7 }
  0x86   : > { %802 = vrot.lane.b32.xlu1 %v3562_v34, %s3335_s6  ;;  %919 = vrot.lane.b32.xlu0 %v3562_v34, %s3338_s26 }
  0x8a   : > { %767 = vrot.lane.b32.xlu1 %v3547_v20, %s3337_s7  ;;  %839 = vrot.lane.b32.xlu0 %v3534_v13, %s3334_s5 }
  0x8e   : > { %921 = vrot.lane.b32.xlu1 %v3604_v61, %s3338_s26  ;;  %886 = vrot.lane.b32.xlu0 %v3592_v52, %s3336_s30 }
  0x90   : > { %v3820_v60 = vpop.permute.xlu0 %736  ;;  %v3822_v2 = vpop.permute.xlu1 %734 }
  0x92   : > { %841 = vrot.lane.b32.xlu1 %v3573_v41, %s3334_s5  ;;  %804 = vrot.lane.b32.xlu0 %v3604_v61, %s3335_s6 }
  0x94   : > { %v3828_v20 = vpop.permute.xlu1 %718  ;;  %v698_v34 = vpop.permute.xlu0 %697 }
  0x96   : > { %888 = vrot.lane.b32.xlu1 %v3660_v46, %s3336_s30  ;;  %769 = vrot.lane.b32.xlu0 %v3592_v52, %s3337_s7  ;;  %v3188_v52 = vld [vmem:[%s4511_s1 + $0x100] sm:$0xff]  }
  0x98   : > { %v700_v22 = vpop.permute.xlu1 %699  ;;  %v682_v49 = vpop.permute.xlu0 %681 }
  0x9a   : > { %806 = vrot.lane.b32.xlu1 %v3687_v0, %s3335_s6  ;;  %923 = vrot.lane.b32.xlu0 %v3687_v0, %s3338_s26 }
  0x9c   : > { %v601_v61 = vpop.permute.xlu1 %600  ;;  %v617_v57 = vpop.permute.xlu0 %616 }
  0x9d   : > { %v1002_v17 = vsel %vm1000_vm2, %v601_v61, %v682_v49  ;;  %v953_v62 = vsel %vm951_vm4, %v3465_v14, %v601_v61  ;;  %v1018_v0 = vsel %vm1000_vm2, %v617_v57, %v698_v34  ;;  %v3194_v61 = vld [vmem:[%s4511_s1 + $0x90] sm:$0xff]  }
  0x9e   : > { %771 = vrot.lane.b32.xlu1 %v3660_v46, %s3337_s7  ;;  %v1035_v12 = vsel %vm1033_vm3, %v1002_v17, %v3828_v20  ;;  %843 = vrot.lane.b32.xlu0 %v3615_v18, %s3334_s5  ;;  %v1059_v14 = vsel %vm1033_vm3, %v1018_v0, %v3822_v2  ;;  %v977_v46 = vsel %vm951_vm4, %v3455_v7, %v617_v57  ;;  %v3191_v7 = vld [vmem:[%s4511_s1 + $0x88] sm:$0xff]  }
  0x9f   : > { %1695 = vmatprep.mubr.bf16.mxu0 %v1035_v12  ;;  %1759 = vmatprep.mubr.bf16.mxu1 %v1059_v14  ;;  %v3197_v12 = vld [vmem:[%s4511_s1 + $0x98] sm:$0xff]   ;;  %v3198_v14 = vld [vmem:[%s4511_s1 + $0xe0] sm:$0xff]  }
  0xa0   : > { %1696 = vmatmul.mubr.bf16.vlgmr.msra.gmra.mrb[0].mxu0 %v953_v62  ;;  %v603_v23 = vpop.permute.xlu1 %602  ;;  %1760 = vmatmul.mubr.bf16.vlgmr.msra.gmra.mrb[0].mxu1 %v977_v46  ;;  %v619_v27 = vpop.permute.xlu0 %618  ;;  %v3199_v46 = vld [vmem:[%s4511_s1 + $0x120] sm:$0xff]  }
  0xa1   : > { %1986 = vmatpush1.bf16.msra.mxu0 %v3188_v52  ;;  %v1020_v35 = vsel %vm1000_vm2, %v619_v27, %v700_v22  ;;  %2939 = vmatpush3.bf16.msra.mxu1 %v3187_v19  ;;  %v3193_v22 = vld [vmem:[%s4511_s1 + $0x110] sm:$0xff]   ;;  %v980_v57 = vsel %vm951_vm4, %v3448_v6, %v619_v27  ;;  %v956_v17 = vsel %vm951_vm4, %v3459_v9, %v603_v23  ;;  %v3196_v6 = vld [vmem:[%s4511_s1 + $0x118] sm:$0xff]   ;;  %v3200_v27 = vld [vmem:[%s4511_s1 + $0xa0] sm:$0xff]  }
  0xa2   : > { %925 = vrot.lane.b32.xlu1 %v3733_v51, %s3338_s26  ;;  %890 = vrot.lane.b32.xlu0 %v3719_v29, %s3336_s30  ;;  %v1062_v48 = vsel %vm1033_vm3, %v1020_v35, %v3820_v60 }
  0xa3   : > { %1987 = vmatprep.subr.bf16.mxu0 %v3333_v50  ;;  %1767 = vmatprep.mubr.bf16.mxu1 %v1062_v48 }
  0xa4   : > { %v3875_v53 = vpop.permute.xlu1 %720  ;;  %2940 = vmatprep.subr.bf16.mxu1 %v3189_v21  ;;  %v684_v1 = vpop.permute.xlu0 %683 }
  0xa5   : > { %1988 = vmatpush1.bf16.msra.mxu0 %v3190_v33  ;;  %v1004_v34 = vsel %vm1000_vm2, %v603_v23, %v684_v1  ;;  %2941 = vmatpush3.bf16.msra.mxu1 %v3191_v7 }
  0xa6   : > { %845 = vrot.lane.b32.xlu1 %v3675_v58, %s3334_s5  ;;  %808 = vrot.lane.b32.xlu0 %v3733_v51, %s3335_s6  ;;  %v1038_v49 = vsel %vm1033_vm3, %v1004_v34, %v3875_v53  ;;  %v3195_v51 = vld [vmem:[%s4511_s1 + $0xd8] sm:$0xff]   ;;  %v3204_v34 = vld [vmem:[%s4511_s1 + $0xf0] sm:$0xff]  }
  0xa7   : > { %1989 = vmatprep.subr.bf16.mxu0 %v3333_v50  ;;  %1703 = vmatprep.mubr.bf16.mxu0 %v1038_v49 }
  0xa8   : > { %v702_v62 = vpop.permute.xlu1 %701  ;;  %2942 = vmatprep.subr.bf16.mxu1 %v3192_v59  ;;  %1768 = vmatmul.mubr.bf16.gmra.mrb[4].mxu1 %v980_v57  ;;  %v621_v52 = vpop.permute.xlu0 %620  ;;  %v3206_v57 = vld [vmem:[%s4511_s1 + $0xb0] sm:$0xff]  }
  0xa9   : > { %1704 = vmatmul.mubr.bf16.gmra.mrb[4].mxu0 %v956_v17  ;;  %2943 = vmatpush3.bf16.msra.mxu1 %v3194_v61  ;;  %v1022_v0 = vsel %vm1000_vm2, %v621_v52, %v702_v62  ;;  %v983_v23 = vsel %vm951_vm4, %v3445_v5, %v621_v52  ;;  %v3202_v5 = vld [vmem:[%s4511_s1 + $0x128] sm:$0xff]   ;;  %v3214_v17 = vld [vmem:[%s3439_s21 + $0x60] sm:$0xff]  }
  0xaa   : > { %892 = vrot.lane.b32.xlu1 %v3756_v11, %s3336_s30  ;;  %1990 = vmatpush1.bf16.msra.mxu0 %v3193_v22 }
  0xab   : > { %773 = vrot.lane.b32.xlu0 %v3719_v29, %s3337_s7  ;;  %1991 = vmatprep.subr.bf16.mxu0 %v3333_v50 }
  0xac   : > { %v605_v9 = vpop.permute.xlu1 %604  ;;  %2944 = vmatprep.subr.bf16.mxu1 %v3195_v51  ;;  %v3913_v19 = vpop.permute.xlu0 %738  ;;  %v3207_v51 = vld [vmem:[%s4511_s1 + $0xf8] sm:$0xff]  }
  0xad   : > { %v1065_v29 = vsel %vm1033_vm3, %v1022_v0, %v3913_v19  ;;  %2945 = vmatpush3.bf16.msra.mxu1 %v3197_v12  ;;  %v959_v48 = vsel %vm951_vm4, %v3493_v43, %v605_v9  ;;  %v3205_v43 = vld [vmem:[%s4511_s1 + $0x130] sm:$0xff]   ;;  %v3210_v12 = vld [vmem:[%s4511_s1 + $0x140] ss:$0 sps:$4 sm:$0xff]  }
  0xae   : > { %810 = vrot.lane.b32.xlu1 %v3766_v31, %s3335_s6  ;;  %1992 = vmatpush1.bf16.msra.mxu0 %v3196_v6  ;;  %v3208_v6 = vld [vmem:[%s4511_s1 + $0x138] sm:$0xff]  }
  0xaf   : > { %927 = vrot.lane.b32.xlu0 %v3766_v31, %s3338_s26  ;;  %1775 = vmatprep.mubr.bf16.mxu1 %v1065_v29  ;;  %v3201_v31 = vld [vmem:[%s4511_s1 + $0xe8] sm:$0xff]  }
  0xb0   : > { %v3929_v21 = vpop.permute.xlu1 %722  ;;  %1993 = vmatprep.subr.bf16.mxu0 %v3333_v50  ;;  %v686_v33 = vpop.permute.xlu0 %685  ;;  %1776 = vmatmul.mubr.bf16.gmra.mrb[8].mxu1 %v983_v23  ;;  %v1661_v23 = vsel %vm1659_vm5, %v3210_v12, 0 }
  0xb1   : > { %2946 = vmatprep.subr.bf16.mxu1 %v3198_v14  ;;  %v1006_v35 = vsel %vm1000_vm2, %v605_v9, %v686_v33 }
  0xb2   : > { %775 = vrot.lane.b32.xlu1 %v3756_v11, %s3337_s7  ;;  %1994 = vmatpush1.bf16.msra.mxu0 %v3199_v46  ;;  %v1041_v7 = vsel %vm1033_vm3, %v1006_v35, %v3929_v21  ;;  %v3203_v11 = vld [vmem:[%s4511_s1 + $0xa8] sm:$0xff]  }
  0xb3   : > { %847 = vrot.lane.b32.xlu0 %v3736_v54, %s3334_s5  ;;  %1995 = vmatprep.subr.bf16.mxu0 %v3333_v50 }
  0xb4   : > { %1711 = vmatprep.mubr.bf16.mxu0 %v1041_v7  ;;  %v704_v59 = vpop.permute.xlu1 %703  ;;  %2947 = vmatpush3.bf16.msra.mxu1 %v3200_v27  ;;  %v623_v1 = vpop.permute.xlu0 %622 }
  0xb5   : > { %1712 = vmatmul.mubr.bf16.gmra.mrb[8].mxu0 %v959_v48  ;;  %2948 = vmatprep.subr.bf16.mxu1 %v3201_v31  ;;  %v1024_v49 = vsel %vm1000_vm2, %v623_v1, %v704_v59  ;;  %v986_v52 = vsel %vm951_vm4, %v3524_v8, %v623_v1  ;;  %v3216_v1 = vld [vmem:[%s3439_s21 + $0x78] sm:$0xff]  }
  0xb6   : > { %929 = vrot.lane.b32.xlu1 %v3794_v3, %s3338_s26  ;;  %1996 = vmatpush1.bf16.msra.mxu0 %v3202_v5 }
  0xb7   : > { %894 = vrot.lane.b32.xlu0 %v3786_v39, %s3336_s30  ;;  %1997 = vmatprep.subr.bf16.mxu0 %v3333_v50 }
  0xb8   : > { %v607_v22 = vpop.permute.xlu1 %606  ;;  %2949 = vmatpush3.bf16.msra.mxu1 %v3203_v11  ;;  %v3966_v61 = vpop.permute.xlu0 %740 }
  0xb9   : > { %2950 = vmatprep.subr.bf16.mxu1 %v3204_v34  ;;  %v1068_v62 = vsel %vm1033_vm3, %v1024_v49, %v3966_v61  ;;  %v962_v29 = vsel %vm951_vm4, %v3534_v13, %v607_v22 }
  0xba   : > { %849 = vrot.lane.b32.xlu1 %v3214_v17, %s3334_s5  ;;  %1998 = vmatpush1.bf16.msra.mxu0 %v3205_v43 }
  0xbb   : > { %812 = vrot.lane.b32.xlu0 %v3794_v3, %s3335_s6  ;;  %1783 = vmatprep.mubr.bf16.mxu1 %v1068_v62  ;;  %v3209_v3 = vld [vmem:[%s4511_s1 + $0xb8] sm:$0xff]  }
  0xbc   : > { %1784 = vmatmul.mubr.bf16.gmra.mrb[12].mxu1 %v986_v52  ;;  %v3985_v9 = vpop.permute.xlu1 %724  ;;  %1999 = vmatprep.subr.bf16.mxu0 %v3333_v50  ;;  %v688_v0 = vpop.permute.xlu0 %687 }
  0xbd   : > { %2951 = vmatpush3.bf16.msra.mxu1 %v3206_v57  ;;  %v1008_v8 = vsel %vm1000_vm2, %v607_v22, %v688_v0 }
  0xbe   : > { %896 = vrot.lane.b32.xlu1 %v3496_v44, %s3336_s30  ;;  %2952 = vmatprep.subr.bf16.mxu1 %v3207_v51  ;;  %v1044_v14 = vsel %vm1033_vm3, %v1008_v8, %v3985_v9 }
  0xbf   : > { %777 = vrot.lane.b32.xlu0 %v3786_v39, %s3337_s7  ;;  %2000 = vmatpush1.bf16.msra.mxu0 %v3208_v6  ;;  %v3217_v6 = vld [vmem:[%s3439_s21 + $0x84] sm:$0xff]  }
  0xc0   : > { %1719 = vmatprep.mubr.bf16.mxu0 %v1044_v14  ;;  %v706_v46 = vpop.permute.xlu1 %705  ;;  %2001 = vmatprep.subr.bf16.mxu0 %v3333_v50  ;;  %v625_v27 = vpop.permute.xlu0 %624  ;;  %v3215_v50 = vld [vmem:[%s3439_s21 + $0x6c] sm:$0xff]  }
  0xc1   : > { %1720 = vmatmul.mubr.bf16.gmra.mrb[12].mxu0 %v962_v29  ;;  %2953 = vmatpush3.bf16.msra.mxu1 %v3209_v3  ;;  %v1026_v33 = vsel %vm1000_vm2, %v625_v27, %v706_v46 }
  0xc2   : > { %814 = vrot.lane.b32.xlu1 %v3468_v15, %s3335_s6 }
  0xc3   : > { %931 = vrot.lane.b32.xlu0 %v3468_v15, %s3338_s26  ;;  %2002 = vmatpush1.bf16.msra.mxu0 %v1661_v23  ;;  %v989_v15 = vsel %vm951_vm4, %v3556_v30, %v625_v27 }
  0xc4   : > { %v609_v39 = vpop.permute.xlu1 %608  ;;  %v4009_v31 = vpop.permute.xlu0 %742 }
  0xc5   : > { %v1071_v13 = vsel %vm1033_vm3, %v1026_v33, %v4009_v31  ;;  %v965_v48 = vsel %vm951_vm4, %v3573_v41, %v609_v39 }
  0xc6   : > { %779 = vrot.lane.b32.xlu1 %v3496_v44, %s3337_s7  ;;  %1791 = vmatprep.mubr.bf16.mxu1 %v1071_v13 }
  0xc7   : > { %851 = vrot.lane.b32.xlu0 %v3215_v50, %s3334_s5  ;;  %1792 = vmatmul.mubr.bf16.gmra.mrb[16].mxu1 %v989_v15 }
  0xc8   : > { %v4019_v35 = vpop.permute.xlu1 %726  ;;  %v690_v5 = vpop.permute.xlu0 %689 }
  0xc9   : > { %v1010_v7 = vsel %vm1000_vm2, %v609_v39, %v690_v5 }
  0xca   : > { %933 = vrot.lane.b32.xlu1 %v3481_v24, %s3338_s26  ;;  %v1047_v44 = vsel %vm1033_vm3, %v1010_v7, %v4019_v35 }
  0xcb   : > { %898 = vrot.lane.b32.xlu0 %v3508_v56, %s3336_s30  ;;  %1727 = vmatprep.mubr.bf16.mxu0 %v1047_v44 }
  0xcc   : > { %v708_v59 = vpop.permute.xlu1 %707  ;;  %v627_v11 = vpop.permute.xlu0 %626  ;;  %1728 = vmatmul.mubr.bf16.gmra.mrb[16].mxu0 %v965_v48 }
  0xcd   : > { %v1028_v43 = vsel %vm1000_vm2, %v627_v11, %v708_v59  ;;  %v992_v49 = vsel %vm951_vm4, %v3583_v47, %v627_v11 }
  0xce   : > { %853 = vrot.lane.b32.xlu1 %v3216_v1, %s3334_s5 }
  0xcf   : > { %816 = vrot.lane.b32.xlu0 %v3481_v24, %s3335_s6 }
  0xd0   : > { %v611_v34 = vpop.permute.xlu1 %610  ;;  %v4035_v22 = vpop.permute.xlu0 %744 }
  0xd1   : > { %v1074_v41 = vsel %vm1033_vm3, %v1028_v43, %v4035_v22  ;;  %v968_v62 = vsel %vm951_vm4, %v3615_v18, %v611_v34  ;;  %v756_v43 = vshll.u32 %v3783_v37, 16 }
  0xd2   : > { %900 = vrot.lane.b32.xlu1 %v3537_v16, %s3336_s30  ;;  %1799 = vmatprep.mubr.bf16.mxu1 %v1074_v41 }
  0xd3   : > { %781 = vrot.lane.b32.xlu0 %v3508_v56, %s3337_s7  ;;  %1800 = vmatmul.mubr.bf16.gmra.mrb[20].mxu1 %v992_v49 }
  0xd4   : > { %v4045_v24 = vpop.permute.xlu1 %728  ;;  %v692_v57 = vpop.permute.xlu0 %691 }
  0xd5   : > { %v1012_v17 = vsel %vm1000_vm2, %v611_v34, %v692_v57 }
  0xd6   : > { %818 = vrot.lane.b32.xlu1 %v3531_v10, %s3335_s6  ;;  %v1050_v56 = vsel %vm1033_vm3, %v1012_v17, %v4045_v24 }
  0xd7   : > { %935 = vrot.lane.b32.xlu0 %v3531_v10, %s3338_s26  ;;  %1735 = vmatprep.mubr.bf16.mxu0 %v1050_v56 }
  0xd8   : > { %v710_v51 = vpop.permute.xlu1 %709  ;;  %v629_v52 = vpop.permute.xlu0 %628  ;;  %1736 = vmatmul.mubr.bf16.gmra.mrb[20].mxu0 %v968_v62  ;;  %v758_v62 = vrot.slane %v756_v43, 1 }
  0xd9   : > { %v1030_v0 = vsel %vm1000_vm2, %v629_v52, %v710_v51 }
  0xda   : > { %783 = vrot.lane.b32.xlu1 %v3537_v16, %s3337_s7  ;;  %v995_v16 = vsel %vm951_vm4, %v3630_v28, %v629_v52 }
  0xdb   : > { %855 = vrot.lane.b32.xlu0 %v3217_v6, %s3334_s5 }
  0xdc   : > { %v613_v12 = vpop.permute.xlu1 %612  ;;  %v4061_v10 = vpop.permute.xlu0 %746 }
  0xdd   : > { %v1077_v18 = vsel %vm1033_vm3, %v1030_v0, %v4061_v10  ;;  %v971_v46 = vsel %vm951_vm4, %v3675_v58, %v613_v12 }
  0xde   : > { %937 = vrot.lane.b32.xlu1 %v3570_v38, %s3338_s26  ;;  %1807 = vmatprep.mubr.bf16.mxu1 %v1077_v18  ;;  %v3212_v18 = vld [vmem:[%s3439_s21 + $0xcc] sm:$0xff]  }
  0xdf   : > { %902 = vrot.lane.b32.xlu0 %v3577_v45, %s3336_s30  ;;  %1808 = vmatmul.mubr.bf16.gmra.mrb[24].mxu1 %v995_v16 }
  0xe0   : > { %v4071_v3 = vpop.permute.xlu1 %730  ;;  %v694_v8 = vpop.permute.xlu0 %693 }
  0xe1   : > { %v1014_v14 = vsel %vm1000_vm2, %v613_v12, %v694_v8 }
  0xe2   : > { %857 = vrot.lane.b32.xlu1 %v3556_v30, %s3334_s5  ;;  %v1053_v29 = vsel %vm1033_vm3, %v1014_v14, %v4071_v3 }
  0xe3   : > { %820 = vrot.lane.b32.xlu0 %v3570_v38, %s3335_s6  ;;  %1743 = vmatprep.mubr.bf16.mxu0 %v1053_v29 }
  0xe4   : > { %v712_v23 = vpop.permute.xlu1 %711  ;;  %v631_v27 = vpop.permute.xlu0 %630  ;;  %1744 = vmatmul.mubr.bf16.gmra.mrb[24].mxu0 %v971_v46 }
  0xe5   : > { %v1032_v39 = vsel %vm1000_vm2, %v631_v27, %v712_v23  ;;  %v998_v33 = vsel %vm951_vm4, %v3710_v26, %v631_v27  ;;  %v797_v23 = vrot.slane %v3783_v37, 1 }
  0xe6   : > { %904 = vrot.lane.b32.xlu1 %v3645_v36, %s3336_s30 }
  0xe7   : > { %785 = vrot.lane.b32.xlu0 %v3577_v45, %s3337_s7 }
  0xe8   : > { %v615_v30 = vpop.permute.xlu1 %614  ;;  %v4087_v38 = vpop.permute.xlu0 %748 }
  0xe9   : > { %v1080_v58 = vsel %vm1033_vm3, %v1032_v39, %v4087_v38  ;;  %v3213_v39 = vld [vmem:[%s3439_s21 + $0xd4] ss:$0 sps:$4 sm:$0x11]  }
  0xea   : > { %822 = vrot.lane.b32.xlu1 %v3639_v32, %s3335_s6  ;;  %1815 = vmatprep.mubr.bf16.mxu1 %v1080_v58  ;;  %v875_v58 = vshll.u32 %v3212_v18, 16 }
  0xeb   : > { %939 = vrot.lane.b32.xlu0 %v3639_v32, %s3338_s26  ;;  %1816 = vmatmul.mubr.bf16.gmra.mrb[28].mxu1 %v998_v33  ;;  %v974_v32 = vsel %vm951_vm4, %v3736_v54, %v615_v30 }
  0xec   : > { %v4097_v45 = vpop.permute.xlu1 %732  ;;  %v696_v13 = vpop.permute.xlu0 %695 }
  0xed   : > { %v1016_v50 = vsel %vm1000_vm2, %v615_v30, %v696_v13 }
  0xee   : > { %787 = vrot.lane.b32.xlu1 %v3645_v36, %s3337_s7  ;;  %v1056_v15 = vsel %vm1033_vm3, %v1016_v50, %v4097_v45  ;;  %v877_v50 = vrot.slane %v875_v58, 1 }
  0xef   : > { %859 = vrot.lane.b32.xlu0 %v3583_v47, %s3334_s5  ;;  %1751 = vmatprep.mubr.bf16.mxu0 %v1056_v15  ;;  %v880_v15 = vshll.u32 %v3213_v39, 16 }
  0xf0   : > { %v838_v5 = vpop.permute.xlu1 %837  ;;  %v801_v7 = vpop.permute.xlu0 %800  ;;  %1752 = vmatmul.mubr.bf16.gmra.mrb[28].mxu0 %v974_v32 }
  0xf1   : > { %v1166_v47 = vsel %vm1164_vm6, %v801_v7, %v838_v5  ;;  %v916_v5 = vrot.slane %v3212_v18, 1 }
  0xf2   : > { %941 = vrot.lane.b32.xlu1 %v3698_v4, %s3338_s26 }
  0xf3   : > { %906 = vrot.lane.b32.xlu0 %v3705_v25, %s3336_s30 }
  0xf4   : > { %v885_v36 = vpop.permute.xlu1 %884  ;;  %v766_v44 = vpop.permute.xlu0 %765 }
  0xf5   : > { %v1199_v48 = vsel %vm1197_vm7, %v1166_v47, %v885_v36  ;;  %v1084_v54 = vsel %vm1082_vm8, %v3828_v20, %v766_v44 }
  0xf6   : > { %861 = vrot.lane.b32.xlu1 %v3630_v28, %s3334_s5  ;;  %1856 = vmatprep.mubr.bf16.mxu1 %v1199_v48  ;;  %v1117_v59 = vsel %vm1115_vm9, %v1084_v54, %v801_v7  ;;  %v917_v7 = vrot.slane %v3213_v39, 1 }
  0xf7   : > { %824 = vrot.lane.b32.xlu0 %v3698_v4, %s3335_s6  ;;  %1857 = vmatmul.mubr.bf16.vlgmr.msra.gmra.mrb[32].mxu1 %v1117_v59  ;;  %v3211_v4 = vld [vmem:[%s3439_s21 + $0xc8] ss:$0 sps:$4 sm:$0x11]  }
  0xf8   : > { %v803_v11 = vpop.permute.xlu1 %802  ;;  %v920_v1 = vpop.permute.xlu0 %919  ;;  %v761_v51 = vshll.u32 %v3211_v4, 16  ;;  %v798_v27 = vrot.slane %v3211_v4, 1 }
  0xf9   : > { %v1248_v34 = vsel %vm1246_vm10, %v885_v36, %v920_v1  ;;  %2643 = vmatprep.mubr.msk.bf16.mxu0 %vm1626_vm11, %v920_v1 }
  0xfa   : > { %908 = vrot.lane.b32.xlu1 %v3748_v40, %s3336_s30  ;;  %2018 = vmatmul.mubr.bf16.vlgmr.msra.gmra.mrb[32].mxu0 %v1248_v34 }
  0xfb   : > { %789 = vrot.lane.b32.xlu0 %v3705_v25, %s3337_s7 }
  0xfc   : > { %v768_v28 = vpop.permute.xlu1 %767  ;;  %v840_v20 = vpop.permute.xlu0 %839 }
  0xfd   : > { %v1086_v41 = vsel %vm1082_vm8, %v3875_v53, %v768_v28  ;;  %v1168_v57 = vsel %vm1164_vm6, %v803_v11, %v840_v20  ;;  %v754_v53 = vshrl.u32 %v3783_v37, 16 }
  0xfe   : > { %826 = vrot.lane.b32.xlu1 %v3745_v63, %s3335_s6 }
  0xff   : > { %943 = vrot.lane.b32.xlu0 %v3745_v63, %s3338_s26  ;;  %v1120_v63 = vsel %vm1115_vm9, %v1086_v41, %v803_v11 }
 0x100   : > { %v922_v49 = vpop.permute.xlu1 %921  ;;  %v887_v17 = vpop.permute.xlu0 %886 }
 0x101   : > { %2644 = vmatprep.mubr.msk.bf16.mxu0 %vm1626_vm11, %v922_v49  ;;  %v1202_v25 = vsel %vm1197_vm7, %v1168_v57, %v887_v17  ;;  %v1251_v56 = vsel %vm1246_vm10, %v887_v17, %v922_v49 }
 0x102   : > { %791 = vrot.lane.b32.xlu1 %v3748_v40, %s3337_s7  ;;  %1864 = vmatprep.mubr.bf16.mxu1 %v1202_v25  ;;  %v759_v40 = vor.u32 %v758_v62, %v754_v53 }
 0x103   : > { %863 = vrot.lane.b32.xlu0 %v3710_v26, %s3334_s5  ;;  %2026 = vmatmul.mubr.bf16.gmra.mrb[36].mxu0 %v1251_v56  ;;  %v763_v26 = vrot.slane %v761_v51, 1 }
 0x104   : > { %1865 = vmatmul.mubr.bf16.gmra.mrb[36].mxu1 %v1120_v63  ;;  %v842_v52 = vpop.permute.xlu1 %841  ;;  %v805_v6 = vpop.permute.xlu0 %804 }
 0x105   : > { %v1170_v12 = vsel %vm1164_vm6, %v805_v6, %v842_v52  ;;  %v764_v46 = vsel %vm407_vm1, %v759_v40, %v763_v26 }
 0x106   : > { %945 = vrot.lane.b32.xlu1 %v3773_v42, %s3338_s26 }
 0x107   : > { %910 = vrot.lane.b32.xlu0 %v3776_v55, %s3336_s30 }
 0x108   : > { %v889_v0 = vpop.permute.xlu1 %888  ;;  %v770_v16 = vpop.permute.xlu0 %769 }
 0x109   : > { %v1205_v8 = vsel %vm1197_vm7, %v1170_v12, %v889_v0  ;;  %v1088_v14 = vsel %vm1082_vm8, %v3929_v21, %v770_v16 }
 0x10a   : > { %865 = vrot.lane.b32.xlu1 %v3783_v37, %s3334_s5  ;;  %1872 = vmatprep.mubr.bf16.mxu1 %v1205_v8  ;;  %v1123_v29 = vsel %vm1115_vm9, %v1088_v14, %v805_v6  ;;  %v873_v37 = vshrl.u32 %v3212_v18, 16 }
 0x10b   : > { %828 = vrot.lane.b32.xlu0 %v3773_v42, %s3335_s6  ;;  %v799_v42 = vsel %vm632_vm0, %v797_v23, %v798_v27 }
 0x10c   : > { %1873 = vmatmul.mubr.bf16.gmra.mrb[40].mxu1 %v1123_v29  ;;  %v807_v30 = vpop.permute.xlu1 %806  ;;  %v924_v33 = vpop.permute.xlu0 %923  ;;  %v878_v44 = vor.u32 %v877_v50, %v873_v37 }
 0x10d   : > { %2645 = vmatprep.mubr.msk.bf16.mxu0 %vm1626_vm11, %v924_v33  ;;  %v1254_v21 = vsel %vm1246_vm10, %v889_v0, %v924_v33 }
 0x10e   : > { %912 = vrot.lane.b32.xlu1 %v764_v46, %s3336_s30  ;;  %2034 = vmatmul.mubr.bf16.gmra.mrb[40].mxu0 %v1254_v21 }
 0x10f   : > { %793 = vrot.lane.b32.xlu0 %v3776_v55, %s3337_s7  ;;  %v882_v55 = vrot.slane %v880_v15, 1 }
 0x110   : > { %v772_v13 = vpop.permute.xlu1 %771  ;;  %v844_v32 = vpop.permute.xlu0 %843 }
 0x111   : > { %v1090_v47 = vsel %vm1082_vm8, %v3985_v9, %v772_v13  ;;  %v1172_v48 = vsel %vm1164_vm6, %v807_v30, %v844_v32  ;;  %v918_v9 = vsel %vm632_vm0, %v916_v5, %v917_v7  ;;  %v883_v28 = vsel %vm407_vm1, %v878_v44, %v882_v55 }
 0x112   : > { %830 = vrot.lane.b32.xlu1 %v799_v42, %s3335_s6  ;;  %v1126_v1 = vsel %vm1115_vm9, %v1090_v47, %v807_v30  ;;  %s4339_s6 = sand.u32 1, %s3312_s16  }
 0x113   : > { %947 = vrot.lane.b32.xlu0 %v799_v42, %s3338_s26  ;;  %s2416_s10 = scalar_lea.sflag [#allocation3], %s4339_s6 }
 0x114   : > { %v926_v36 = vpop.permute.xlu1 %925  ;;  %v891_v54 = vpop.permute.xlu0 %890 }
 0x115   : > { %2646 = vmatprep.mubr.msk.bf16.mxu0 %vm1626_vm11, %v926_v36  ;;  %v1208_v59 = vsel %vm1197_vm7, %v1172_v48, %v891_v54  ;;  %v1257_v11 = vsel %vm1246_vm10, %v891_v54, %v926_v36 }
 0x116   : > { %795 = vrot.lane.b32.xlu1 %v764_v46, %s3337_s7  ;;  %1880 = vmatprep.mubr.bf16.mxu1 %v1208_v59 }
 0x117   : > { %867 = vrot.lane.b32.xlu0 %v3212_v18, %s3334_s5  ;;  %2042 = vmatmul.mubr.bf16.gmra.mrb[44].mxu0 %v1257_v11 }
 0x118   : > { %1881 = vmatmul.mubr.bf16.gmra.mrb[44].mxu1 %v1126_v1  ;;  %v846_v34 = vpop.permute.xlu1 %845  ;;  %v809_v20 = vpop.permute.xlu0 %808 }
 0x119   : > { %v1174_v4 = vsel %vm1164_vm6, %v809_v20, %v846_v34 }
 0x11a   : > { %949 = vrot.lane.b32.xlu1 %v918_v9, %s3338_s26 }
 0x11b   : > { %914 = vrot.lane.b32.xlu0 %v883_v28, %s3336_s30  ;;  %s2562_s30 = sshll.u32 %s4339_s6, 7 }
 0x11c   : > { %v893_v43 = vpop.permute.xlu1 %892  ;;  %s4344_s7 = scalar_lea.vmem [#allocation2], %s2562_s30 }
 0x11d   : > { %v774_v41 = vpop.permute.xlu0 %773  ;;  %v1211_v49 = vsel %vm1197_vm7, %v1174_v4, %v893_v43  ;;  %s2437_s24 = sshll.u32 %s4344_s7, 4  ;;  %s4428_s24 = int_to_ptr.vmem [resolvable:$true] %s2437_s24 }
 0x11e   : > { %v1092_v57 = vsel %vm1082_vm8, %v4019_v35, %v774_v41  ;;  %1888 = vmatprep.mubr.bf16.mxu1 %v1211_v49  ;;  %s3218_s11 = scalar_lea.vmem %s4428_s24, 2048  ;;  %p3225_p1 = scmp.lt.s32.totalorder %s4428_s24, %s3223_s13 }
 0x11f   : > { %v1129_v17 = vsel %vm1115_vm9, %v1092_v57, %v809_v20  ;;  %p3219_p12 = scmp.ne.s32.totalorder %s4428_s24, %s3218_s11  ;;  %p3226_p2 = scmp.lt.s32.totalorder %s3224_s14, %s3218_s11 }
 0x120   : > { %1889 = vmatmul.mubr.bf16.gmra.mrb[48].mxu1 %v1129_v17  ;;  %v811_v25 = vpop.permute.xlu1 %810 }
 0x121   : > { %v928_v56 = vpop.permute.xlu0 %927  ;;  %p3220_p13 = pnand %p3219_p12, %p3407_p4  ;;  %p3227_p3 = por %p3226_p2, %p3225_p1 }
 0x122   : > { %2647 = vmatprep.mubr.msk.bf16.mxu0 %vm1626_vm11, %v928_v56  ;;  %v1260_v63 = vsel %vm1246_vm10, %v893_v43, %v928_v56 }
 0x123   : > { %2050 = vmatmul.mubr.bf16.gmra.mrb[48].mxu0 %v1260_v63  ;;  %p3221_p0 = pneg %p3220_p13 }
 0x124   : > { %v776_v53 = vpop.permute.xlu1 %775 }
 0x125   : > { %v848_v62 = vpop.permute.xlu0 %847  ;;  %v1094_v51 = vsel %vm1082_vm8, %v4045_v24, %v776_v53  ;;  %p3228_p5 = pnand %p3227_p3, %p3221_p0 }
 0x126   : > { %v1176_v6 = vsel %vm1164_vm6, %v811_v25, %v848_v62  ;;  %v1132_v12 = vsel %vm1115_vm9, %v1094_v51, %v811_v25 }
 0x128   : > { %v930_v52 = vpop.permute.xlu1 %929 }
 0x129   : > { %v895_v35 = vpop.permute.xlu0 %894  ;;  %2648 = vmatprep.mubr.msk.bf16.mxu0 %vm1626_vm11, %v930_v52 }
 0x12a   : > { %v1214_v40 = vsel %vm1197_vm7, %v1176_v6, %v895_v35  ;;  %v1263_v26 = vsel %vm1246_vm10, %v895_v35, %v930_v52 }
 0x12b   : > { %1896 = vmatprep.mubr.bf16.mxu1 %v1214_v40  ;;  %2058 = vmatmul.mubr.bf16.gmra.mrb[52].mxu0 %v1263_v26 }
 0x12c   : > { %1897 = vmatmul.mubr.bf16.gmra.mrb[52].mxu1 %v1132_v12  ;;  %v850_v0 = vpop.permute.xlu1 %849 }
 0x12d   : > { %v813_v18 = vpop.permute.xlu0 %812 }
 0x12e   : > { %v1178_v16 = vsel %vm1164_vm6, %v813_v18, %v850_v0 }
 0x130   : > { %v897_v24 = vpop.permute.xlu1 %896 }
 0x131   : > { %v778_v8 = vpop.permute.xlu0 %777  ;;  %v1217_v14 = vsel %vm1197_vm7, %v1178_v16, %v897_v24 }
 0x132   : > { %v1096_v29 = vsel %vm1082_vm8, %v4071_v3, %v778_v8  ;;  %1904 = vmatprep.mubr.bf16.mxu1 %v1217_v14 }
 0x133   : > { %v1135_v46 = vsel %vm1115_vm9, %v1096_v29, %v813_v18 }
 0x134   : > { %1905 = vmatmul.mubr.bf16.gmra.mrb[56].mxu1 %v1135_v46  ;;  %v815_v23 = vpop.permute.xlu1 %814 }
 0x135   : > { %v932_v27 = vpop.permute.xlu0 %931 }
 0x136   : > { %2649 = vmatprep.mubr.msk.bf16.mxu0 %vm1626_vm11, %v932_v27  ;;  %v1266_v30 = vsel %vm1246_vm10, %v897_v24, %v932_v27 }
 0x137   : > { %2066 = vmatmul.mubr.bf16.gmra.mrb[56].mxu0 %v1266_v30 }
 0x138   : > { %v780_v39 = vpop.permute.xlu1 %779 }
 0x139   : > { %v852_v58 = vpop.permute.xlu0 %851  ;;  %v1098_v33 = vsel %vm1082_vm8, %v4097_v45, %v780_v39 }
 0x13a   : > { %v1180_v42 = vsel %vm1164_vm6, %v815_v23, %v852_v58  ;;  %v1138_v50 = vsel %vm1115_vm9, %v1098_v33, %v815_v23 }
 0x13c   : > { %v934_v21 = vpop.permute.xlu1 %933 }
 0x13d   : > { %v899_v3 = vpop.permute.xlu0 %898  ;;  %2650 = vmatprep.mubr.msk.bf16.mxu0 %vm1626_vm11, %v934_v21 }
 0x13e   : > { %v1220_v13 = vsel %vm1197_vm7, %v1180_v42, %v899_v3  ;;  %v1269_v37 = vsel %vm1246_vm10, %v899_v3, %v934_v21 }
 0x13f   : > { %1912 = vmatprep.mubr.bf16.mxu1 %v1220_v13  ;;  %2074 = vmatmul.mubr.bf16.gmra.mrb[60].mxu0 %v1269_v37 }
 0x140   : > { %1913 = vmatmul.mubr.bf16.gmra.mrb[60].mxu1 %v1138_v50  ;;  %v854_v15 = vpop.permute.xlu1 %853 }
 0x141   : > { %v817_v32 = vpop.permute.xlu0 %816 }
 0x142   : > { %v1182_v5 = vsel %vm1164_vm6, %v817_v32, %v854_v15 }
 0x144   : > { %v901_v45 = vpop.permute.xlu1 %900 }
 0x145   : > { %v782_v7 = vpop.permute.xlu0 %781  ;;  %v1223_v47 = vsel %vm1197_vm7, %v1182_v5, %v901_v45 }
 0x146   : > { %v1100_v36 = vsel %vm1082_vm8, %v3822_v2, %v782_v7  ;;  %1920 = vmatprep.mubr.bf16.mxu1 %v1223_v47 }
 0x147   : > { %v1141_v44 = vsel %vm1115_vm9, %v1100_v36, %v817_v32 }
 0x148   : > { %1921 = vmatmul.mubr.bf16.gmra.mrb[64].mxu1 %v1141_v44  ;;  %v819_v55 = vpop.permute.xlu1 %818 }
 0x149   : > { %v936_v48 = vpop.permute.xlu0 %935 }
 0x14a   : > { %2651 = vmatprep.mubr.msk.bf16.mxu0 %vm1626_vm11, %v936_v48  ;;  %v1272_v54 = vsel %vm1246_vm10, %v901_v45, %v936_v48 }
 0x14b   : > { %2082 = vmatmul.mubr.bf16.gmra.mrb[64].mxu0 %v1272_v54 }
 0x14c   : > { %v784_v59 = vpop.permute.xlu1 %783 }
 0x14d   : > { %v856_v11 = vpop.permute.xlu0 %855  ;;  %v1102_v1 = vsel %vm1082_vm8, %v3820_v60, %v784_v59 }
 0x14e   : > { %v1184_v34 = vsel %vm1164_vm6, %v819_v55, %v856_v11  ;;  %v1144_v4 = vsel %vm1115_vm9, %v1102_v1, %v819_v55 }
 0x150   : > { %v938_v9 = vpop.permute.xlu1 %937 }
 0x151   : > { %v903_v2 = vpop.permute.xlu0 %902  ;;  %2652 = vmatprep.mubr.msk.bf16.mxu0 %vm1626_vm11, %v938_v9 }
 0x152   : > { %v1226_v28 = vsel %vm1197_vm7, %v1184_v34, %v903_v2  ;;  %v1275_v20 = vsel %vm1246_vm10, %v903_v2, %v938_v9 }
 0x153   : > { %1928 = vmatprep.mubr.bf16.mxu1 %v1226_v28  ;;  %2090 = vmatmul.mubr.bf16.gmra.mrb[68].mxu0 %v1275_v20 }
 0x154   : > { %1929 = vmatmul.mubr.bf16.gmra.mrb[68].mxu1 %v1144_v4  ;;  %v858_v43 = vpop.permute.xlu1 %857 }
 0x155   : > { %v821_v41 = vpop.permute.xlu0 %820 }
 0x156   : > { %v1186_v49 = vsel %vm1164_vm6, %v821_v41, %v858_v43 }
 0x158   : > { %v905_v60 = vpop.permute.xlu1 %904 }
 0x159   : > { %v786_v57 = vpop.permute.xlu0 %785  ;;  %v1229_v17 = vsel %vm1197_vm7, %v1186_v49, %v905_v60 }
 0x15a   : > { %v1104_v25 = vsel %vm1082_vm8, %v3913_v19, %v786_v57  ;;  %1936 = vmatprep.mubr.bf16.mxu1 %v1229_v17 }
 0x15b   : > { %v1147_v56 = vsel %vm1115_vm9, %v1104_v25, %v821_v41 }
 0x15c   : > { %1937 = vmatmul.mubr.bf16.gmra.mrb[72].mxu1 %v1147_v56  ;;  %v823_v63 = vpop.permute.xlu1 %822 }
 0x15d   : > { %v940_v53 = vpop.permute.xlu0 %939 }
 0x15e   : > { %2653 = vmatprep.mubr.msk.bf16.mxu0 %vm1626_vm11, %v940_v53  ;;  %v1278_v62 = vsel %vm1246_vm10, %v905_v60, %v940_v53 }
 0x15f   : > { %2098 = vmatmul.mubr.bf16.gmra.mrb[72].mxu0 %v1278_v62 }
 0x160   : > { %v788_v51 = vpop.permute.xlu1 %787 }
 0x161   : > { %v860_v52 = vpop.permute.xlu0 %859  ;;  %v1106_v6 = vsel %vm1082_vm8, %v3966_v61, %v788_v51 }
 0x162   : > { %v1188_v40 = vsel %vm1164_vm6, %v823_v63, %v860_v52  ;;  %v1150_v0 = vsel %vm1115_vm9, %v1106_v6, %v823_v63 }
 0x164   : > { %v942_v35 = vpop.permute.xlu1 %941 }
 0x165   : > { %v907_v19 = vpop.permute.xlu0 %906  ;;  %2654 = vmatprep.mubr.msk.bf16.mxu0 %vm1626_vm11, %v942_v35 }
 0x166   : > { %v1232_v26 = vsel %vm1197_vm7, %v1188_v40, %v907_v19  ;;  %v1281_v12 = vsel %vm1246_vm10, %v907_v19, %v942_v35 }
 0x167   : > { %1944 = vmatprep.mubr.bf16.mxu1 %v1232_v26  ;;  %2106 = vmatmul.mubr.bf16.gmra.mrb[76].mxu0 %v1281_v12 }
 0x168   : > { %1945 = vmatmul.mubr.bf16.gmra.mrb[76].mxu1 %v1150_v0  ;;  %v862_v18 = vpop.permute.xlu1 %861 }
 0x169   : > { %v825_v16 = vpop.permute.xlu0 %824 }
 0x16a   : > { %v1190_v24 = vsel %vm1164_vm6, %v825_v16, %v862_v18 }
 0x16c   : > { %v909_v61 = vpop.permute.xlu1 %908 }
 0x16d   : > { %v790_v8 = vpop.permute.xlu0 %789  ;;  %v1235_v14 = vsel %vm1197_vm7, %v1190_v24, %v909_v61 }
 0x16e   : > { %v1108_v29 = vsel %vm1082_vm8, %v4009_v31, %v790_v8  ;;  %1952 = vmatprep.mubr.bf16.mxu1 %v1235_v14 }
 0x16f   : > { %v1153_v46 = vsel %vm1115_vm9, %v1108_v29, %v825_v16 }
 0x170   : > { %1953 = vmatmul.mubr.bf16.gmra.mrb[80].mxu1 %v1153_v46  ;;  %v827_v23 = vpop.permute.xlu1 %826 }
 0x171   : > { %v944_v27 = vpop.permute.xlu0 %943 }
 0x172   : > { %2655 = vmatprep.mubr.msk.bf16.mxu0 %vm1626_vm11, %v944_v27  ;;  %v1284_v30 = vsel %vm1246_vm10, %v909_v61, %v944_v27 }
 0x173   : > { %2114 = vmatmul.mubr.bf16.gmra.mrb[80].mxu0 %v1284_v30  ;;  %v2842_v39 = vpop.f32.mrb[0].mxu0  ;;  %v2890_v58 = vpop.f32.mrb[0].mxu1 }
 0x174   : > { %v2843_v33 = vpop.f32.mrb[1].mxu0  ;;  %v2891_v21 = vpop.f32.mrb[1].mxu1 }
 0x175   : > { %v864_v42 = vpop.permute.xlu0 %863  ;;  %v4246_v3 = vadd.f32 %v2843_v33, %v2842_v39  ;;  %v4248_v13 = vadd.f32 %v2891_v21, %v2890_v58  ;;  %v792_v31 = vpop.permute.xlu1 %791 }
 0x176   : > { %v2845_v37 = vpop.f32.mrb[2].mxu0  ;;  %v2893_v50 = vpop.f32.mrb[2].mxu1  ;;  %v1110_v32 = vsel %vm1082_vm8, %v4035_v22, %v792_v31  ;;  %v1192_v7 = vsel %vm1164_vm6, %v827_v23, %v864_v42 }
 0x177   : > { %v2846_v15 = vpop.f32.mrb[3].mxu0  ;;  %v2894_v45 = vpop.f32.mrb[3].mxu1  ;;  %v1156_v54 = vsel %vm1115_vm9, %v1110_v32, %v827_v23 }
 0x178   : > { %v4252_v5 = vadd.f32 %v2846_v15, %v2845_v37  ;;  %v4255_v47 = vadd.f32 %v2894_v45, %v2893_v50 }
 0x179   : > { %v911_v36 = vpop.permute.xlu0 %910  ;;  %v946_v44 = vpop.permute.xlu1 %945 }
 0x17a   : > { %v1238_v55 = vsel %vm1197_vm7, %v1192_v7, %v911_v36  ;;  %2656 = vmatprep.mubr.msk.bf16.mxu0 %vm1626_vm11, %v946_v44  ;;  %v1287_v48 = vsel %vm1246_vm10, %v911_v36, %v946_v44 }
 0x17b   : > { %1960 = vmatprep.mubr.bf16.mxu1 %v1238_v55  ;;  %2122 = vmatmul.mubr.bf16.gmra.mrb[84].mxu0 %v1287_v48  ;;  %v2896_v59 = vpop.f32.mrb[4].mxu1 }
 0x17c   : > { %v2848_v22 = vpop.f32.mrb[4].mxu0  ;;  %1961 = vmatmul.mubr.bf16.gmra.mrb[84].mxu1 %v1156_v54  ;;  %v2897_v11 = vpop.f32.mrb[5].mxu1 }
 0x17d   : > { %v829_v1 = vpop.permute.xlu0 %828  ;;  %v4261_v9 = vadd.f32 %v2897_v11, %v2896_v59  ;;  %v2849_v34 = vpop.f32.mrb[5].mxu0 }
 0x17e   : > { %v866_v2 = vpop.permute.xlu1 %865  ;;  %v4263_v28 = vadd.f32 %v2849_v34, %v2848_v22  ;;  %v2851_v20 = vpop.f32.mrb[6].mxu0 }
 0x17f   : > { %v2899_v4 = vpop.f32.mrb[6].mxu1  ;;  %v2852_v43 = vpop.f32.mrb[7].mxu0  ;;  %v1194_v17 = vsel %vm1164_vm6, %v829_v1, %v866_v2 }
 0x180   : > { %v2900_v41 = vpop.f32.mrb[7].mxu1  ;;  %v4265_v49 = vadd.f32 %v2852_v43, %v2851_v20 }
 0x181   : > { %v4267_v60 = vadd.f32 %v2900_v41, %v2899_v4  ;;  %v794_v57 = vpop.permute.xlu0 %793 }
 0x182   : > { %v1112_v25 = vsel %vm1082_vm8, %v4061_v10, %v794_v57  ;;  %v913_v56 = vpop.permute.xlu1 %912 }
 0x183   : > { %v1241_v63 = vsel %vm1197_vm7, %v1194_v17, %v913_v56  ;;  %v1159_v53 = vsel %vm1115_vm9, %v1112_v25, %v829_v1  ;;  %v2902_v62 = vpop.f32.mrb[8].mxu1 }
 0x184   : > { %1968 = vmatprep.mubr.bf16.mxu1 %v1241_v63  ;;  %v2903_v52 = vpop.f32.mrb[9].mxu1 }
 0x185   : > { %1969 = vmatmul.mubr.bf16.gmra.mrb[88].mxu1 %v1159_v53  ;;  %v948_v51 = vpop.permute.xlu0 %947  ;;  %v4274_v6 = vadd.f32 %v2903_v52, %v2902_v62  ;;  %v2905_v40 = vpop.f32.mrb[10].mxu1 }
 0x186   : > { %v831_v35 = vpop.permute.xlu1 %830  ;;  %2657 = vmatprep.mubr.msk.bf16.mxu0 %vm1626_vm11, %v948_v51  ;;  %v1290_v19 = vsel %vm1246_vm10, %v913_v56, %v948_v51  ;;  %v2906_v26 = vpop.f32.mrb[11].mxu1 }
 0x187   : > { %2130 = vmatmul.mubr.bf16.gmra.mrb[88].mxu0 %v1290_v19  ;;  %v4278_v10 = vadd.f32 %v2906_v26, %v2905_v40 }
 0x188   : > { %v2854_v12 = vpop.f32.mrb[8].mxu0 }
 0x189   : > { %v868_v0 = vpop.permute.xlu0 %867  ;;  %v2855_v18 = vpop.f32.mrb[9].mxu0 }
 0x18a   : > { %v4280_v16 = vadd.f32 %v2855_v18, %v2854_v12  ;;  %v796_v24 = vpop.permute.xlu1 %795  ;;  %v2857_v61 = vpop.f32.mrb[10].mxu0  ;;  %v1196_v46 = vsel %vm1164_vm6, %v831_v35, %v868_v0 }
 0x18b   : > { %v2858_v8 = vpop.f32.mrb[11].mxu0  ;;  %v1114_v14 = vsel %vm1082_vm8, %v4087_v38, %v796_v24 }
 0x18c   : > { %v4284_v29 = vadd.f32 %v2858_v8, %v2857_v61  ;;  %v1162_v33 = vsel %vm1115_vm9, %v1114_v14, %v831_v35 }
 0x18d   : > { %v915_v23 = vpop.permute.xlu0 %914 }
 0x18e   : > { %v950_v27 = vpop.permute.xlu1 %949  ;;  %v1244_v30 = vsel %vm1197_vm7, %v1196_v46, %v915_v23 }
 0x18f   : > { %2658 = vmatprep.mubr.msk.bf16.mxu0 %vm1626_vm11, %v950_v27  ;;  %v2908_v39 = vpop.f32.mrb[12].mxu1  ;;  %1976 = vmatprep.mubr.bf16.mxu1 %v1244_v30  ;;  %v1293_v58 = vsel %vm1246_vm10, %v915_v23, %v950_v27 }
 0x190   : > { %2138 = vmatmul.mubr.bf16.gmra.mrb[92].mxu0 %v1293_v58  ;;  %v2909_v21 = vpop.f32.mrb[13].mxu1  ;;  %1977 = vmatmul.mubr.bf16.gmra.mrb[92].mxu1 %v1162_v33 }
 0x191   : > { %v4291_v38 = vadd.f32 %v2909_v21, %v2908_v39  ;;  %v2911_v42 = vpop.f32.mrb[14].mxu1 }
 0x192   : > { %v2912_v31 = vpop.f32.mrb[15].mxu1 }
 0x193   : > { %v4293_v37 = vadd.f32 %v2912_v31, %v2911_v42 }
 0x194   : > { %v2860_v50 = vpop.f32.mrb[12].mxu0 }
 0x195   : > { %v2861_v15 = vpop.f32.mrb[13].mxu0 }
 0x196   : > { %v4295_v32 = vadd.f32 %v2861_v15, %v2860_v50  ;;  %v2863_v45 = vpop.f32.mrb[14].mxu0 }
 0x197   : > { %v2864_v7 = vpop.f32.mrb[15].mxu0 }
 0x198   : > { %v4297_v36 = vadd.f32 %v2864_v7, %v2863_v45 }
 0x19a   : > { %v2914_v44 = vpop.f32.mrb[16].mxu1 }
 0x19b   : > { %v2915_v55 = vpop.f32.mrb[17].mxu1 }
 0x19c   : > { %v4299_v48 = vadd.f32 %v2915_v55, %v2914_v44  ;;  %v2917_v54 = vpop.f32.mrb[18].mxu1  ;;  %v4334_v44 = vld [vmem:[%s4512_s2] ss:$0 sm:$0xff] }
 0x19d   : > { %v2918_v22 = vpop.f32.mrb[19].mxu1 }
 0x19e   : > { %v4301_v59 = vadd.f32 %v2918_v22, %v2917_v54  ;;  %v1698_v22 = vadd.f32 %v4246_v3, %v4334_v44 }
 0x19f   : > { %v2866_v11 = vpop.f32.mrb[16].mxu0 }
 0x1a0   : > { %v2867_v1 = vpop.f32.mrb[17].mxu0 }
 0x1a1   : > { %v4303_v34 = vadd.f32 %v2867_v1, %v2866_v11  ;;  %v2869_v2 = vpop.f32.mrb[18].mxu0 }
 0x1a2   : > { %v2870_v20 = vpop.f32.mrb[19].mxu0 }
 0x1a3   : > { %v4305_v4 = vadd.f32 %v2870_v20, %v2869_v2 }
 0x1a6   : > { %v2920_v43 = vpop.f32.mrb[20].mxu1 }
 0x1a7   : > { %v2921_v41 = vpop.f32.mrb[21].mxu1 }
 0x1a8   : > { %v4307_v57 = vadd.f32 %v2921_v41, %v2920_v43  ;;  %v2923_v17 = vpop.f32.mrb[22].mxu1  ;;  %v1701_v43 = vadd.f32 %v4252_v5, %v4334_v44 }
 0x1a9   : > { %v2924_v25 = vpop.f32.mrb[23].mxu1 }
 0x1aa   : > { %v4309_v56 = vadd.f32 %v2924_v25, %v2923_v17 }
 0x1ab   : > { %v2872_v63 = vpop.f32.mrb[20].mxu0 }
 0x1ac   : > { %v2873_v53 = vpop.f32.mrb[21].mxu0 }
 0x1ad   : > { %v4311_v62 = vadd.f32 %v2873_v53, %v2872_v63  ;;  %v2875_v51 = vpop.f32.mrb[22].mxu0 }
 0x1ae   : > { %v2876_v52 = vpop.f32.mrb[23].mxu0 }
 0x1af   : > { %v4313_v35 = vadd.f32 %v2876_v52, %v2875_v51 }
 0x1b2   : > { %v2926_v40 = vpop.f32.mrb[24].mxu1 }
 0x1b3   : > { %v2927_v19 = vpop.f32.mrb[25].mxu1 }
 0x1b4   : > { %v4315_v26 = vadd.f32 %v2927_v19, %v2926_v40  ;;  %v2929_v12 = vpop.f32.mrb[26].mxu1 }
 0x1b5   : > { %v2930_v0 = vpop.f32.mrb[27].mxu1 }
 0x1b6   : > { %v4317_v18 = vadd.f32 %v2930_v0, %v2929_v12 }
 0x1b7   : > { %v2878_v24 = vpop.f32.mrb[24].mxu0 }
 0x1b8   : > { %v2879_v61 = vpop.f32.mrb[25].mxu0 }
 0x1b9   : > { %v4319_v8 = vadd.f32 %v2879_v61, %v2878_v24  ;;  %v2881_v14 = vpop.f32.mrb[26].mxu0 }
 0x1ba   : > { %v2882_v46 = vpop.f32.mrb[27].mxu0 }
 0x1bb   : > { %v4321_v23 = vadd.f32 %v2882_v46, %v2881_v14 }
 0x1be   : > { %v2932_v27 = vpop.f32.mrb[28].mxu1 }
 0x1bf   : > { %v2933_v30 = vpop.f32.mrb[29].mxu1 }
 0x1c0   : > { %v4323_v39 = vadd.f32 %v2933_v30, %v2932_v27  ;;  %v2935_v58 = vpop.f32.mrb[30].mxu1  ;;  %v1706_v27 = vadd.f32 %v4263_v28, %v4334_v44  ;;  %v1714_v28 = vadd.f32 %v4280_v16, %v4334_v44 }
 0x1c1   : > { %v2936_v33 = vpop.f32.mrb[31].mxu1 }
 0x1c2   : > { %v4325_v21 = vadd.f32 %v2936_v33, %v2935_v58 }
 0x1c3   : > { %v2884_v42 = vpop.f32.mrb[28].mxu0 }
 0x1c4   : > { %v2885_v31 = vpop.f32.mrb[29].mxu0 }
 0x1c5   : > { %v4327_v50 = vadd.f32 %v2885_v31, %v2884_v42  ;;  %v2887_v15 = vpop.f32.mrb[30].mxu0 }
 0x1c6   : > { %v2888_v45 = vpop.f32.mrb[31].mxu0 }
 0x1c7   : > { %v4329_v7 = vadd.f32 %v2888_v45, %v2887_v15  ;;  %v1709_v15 = vadd.f32 %v4265_v49, %v4334_v44 }
 0x1ca   : > { %v2954_v55 = vpop.f32.mrb[32].mxu1 }
 0x1cb   : > { %v2955_v54 = vpop.f32.mrb[33].mxu1 }
 0x1cc   : > { %v2956_v11 = vadd.f32 %v2955_v54, %v2954_v55  ;;  %v2957_v1 = vpop.f32.mrb[34].mxu1 }
 0x1cd   : > { %v2958_v2 = vpop.f32.mrb[35].mxu1  ;;  %v2019_v20 = vpop.f32.mrb[32].mxu0 }
 0x1ce   : > { %v2959_v41 = vadd.f32 %v2958_v2, %v2957_v1  ;;  %v1859_v17 = vadd.f32 %v2956_v11, %v1698_v22  ;;  %v2021_v25 = vpop.f32.mrb[33].mxu0 }
 0x1cf   : > { %v2022_v63 = vpop.f32.mrb[34].mxu0 }
 0x1d0   : > { %v2020_v53 = vadd.f32 %v2019_v20, %v1859_v17  ;;  %v1862_v51 = vadd.f32 %v2959_v41, %v1701_v43  ;;  %v2024_v52 = vpop.f32.mrb[35].mxu0 }
 0x1d2   : > { %v2023_v40 = vadd.f32 %v2022_v63, %v1862_v51  ;;  %v2343_v3 = vmul.f32 %v2020_v53, %v2020_v53 }
 0x1d4   : > { %v2734_v19 = vpack.c.bf16 %v2023_v40, %v2020_v53  ;;  %v2306_v12 = vadd.f32 %v2023_v40, %v2020_v53  ;;  %v2344_v0 = vmul.f32 %v2023_v40, %v2023_v40  ;;  %v1717_v40 = vadd.f32 %v4284_v29, %v4334_v44 }
 0x1d6   : > { %2735 = vst [vmem:[%s4344_s7] sm:$0xff] %v2734_v19   ;;  %v2375_v24 = vadd.f32 %v2344_v0, %v2343_v3  ;;  %v2027_v61 = vpop.f32.mrb[36].mxu0 }
 0x1d7   : > { %v2960_v5 = vpop.f32.mrb[36].mxu1  ;;  %v2029_v14 = vpop.f32.mrb[37].mxu0 }
 0x1d8   : > { %v2961_v46 = vpop.f32.mrb[37].mxu1  ;;  %v2030_v58 = vpop.f32.mrb[38].mxu0 }
 0x1d9   : > { %v2962_v30 = vadd.f32 %v2961_v46, %v2960_v5  ;;  %v2963_v33 = vpop.f32.mrb[38].mxu1  ;;  %v2032_v42 = vpop.f32.mrb[39].mxu0 }
 0x1da   : > { %v2964_v31 = vpop.f32.mrb[39].mxu1 }
 0x1db   : > { %v1867_v45 = vadd.f32 %v2962_v30, %v1706_v27  ;;  %v2965_v55 = vadd.f32 %v2964_v31, %v2963_v33 }
 0x1dd   : > { %v2028_v54 = vadd.f32 %v2027_v61, %v1867_v45  ;;  %v1870_v22 = vadd.f32 %v2965_v55, %v1709_v15 }
 0x1df   : > { %v2345_v11 = vmul.f32 %v2028_v54, %v2028_v54  ;;  %v2031_v1 = vadd.f32 %v2030_v58, %v1870_v22  ;;  %v2966_v2 = vpop.f32.mrb[40].mxu1  ;;  %v2307_v20 = vadd.f32 %v2306_v12, %v2028_v54 }
 0x1e0   : > { %v2967_v43 = vpop.f32.mrb[41].mxu1 }
 0x1e1   : > { %v2739_v41 = vpack.c.bf16 %v2031_v1, %v2028_v54  ;;  %v2346_v17 = vmul.f32 %v2031_v1, %v2031_v1  ;;  %v2968_v25 = vadd.f32 %v2967_v43, %v2966_v2  ;;  %v2969_v63 = vpop.f32.mrb[42].mxu1  ;;  %v2308_v53 = vadd.f32 %v2307_v20, %v2031_v1  ;;  %v2035_v49 = vpop.f32.mrb[40].mxu0 }
 0x1e2   : > { %v2970_v51 = vpop.f32.mrb[43].mxu1  ;;  %v2376_v52 = vadd.f32 %v2375_v24, %v2345_v11  ;;  %v2037_v12 = vpop.f32.mrb[41].mxu0  ;;  %v1722_v54 = vadd.f32 %v4295_v32, %v4334_v44  ;;  %v1730_v32 = vadd.f32 %v4303_v34, %v4334_v44 }
 0x1e3   : > { %2811 = vst [vmem:[%s4344_s7 + $0x8] sm:$0xff] %v2739_v41   ;;  %v2971_v3 = vadd.f32 %v2970_v51, %v2969_v63  ;;  %v1875_v19 = vadd.f32 %v2968_v25, %v1714_v28  ;;  %v2038_v61 = vpop.f32.mrb[42].mxu0  ;;  %v1725_v28 = vadd.f32 %v4297_v36, %v4334_v44 }
 0x1e4   : > { %v2377_v0 = vadd.f32 %v2376_v52, %v2346_v17  ;;  %v2040_v14 = vpop.f32.mrb[43].mxu0 }
 0x1e5   : > { %v2036_v16 = vadd.f32 %v2035_v49, %v1875_v19  ;;  %v1878_v5 = vadd.f32 %v2971_v3, %v1717_v40 }
 0x1e7   : > { %v2309_v46 = vadd.f32 %v2308_v53, %v2036_v16  ;;  %v2347_v27 = vmul.f32 %v2036_v16, %v2036_v16  ;;  %v2039_v30 = vadd.f32 %v2038_v61, %v1878_v5  ;;  %v1733_v5 = vadd.f32 %v4305_v4, %v4334_v44 }
 0x1e9   : > { %v2378_v58 = vadd.f32 %v2377_v0, %v2347_v27  ;;  %v2744_v33 = vpack.c.bf16 %v2039_v30, %v2036_v16  ;;  %v2310_v42 = vadd.f32 %v2309_v46, %v2039_v30  ;;  %v2348_v24 = vmul.f32 %v2039_v30, %v2039_v30 }
 0x1ea   : > { %v2043_v29 = vpop.f32.mrb[44].mxu0 }
 0x1eb   : > { %2812 = vst [vmem:[%s4344_s7 + $0x10] sm:$0xff] %v2744_v33   ;;  %v2379_v31 = vadd.f32 %v2378_v58, %v2348_v24  ;;  %v2972_v15 = vpop.f32.mrb[44].mxu1  ;;  %v2045_v45 = vpop.f32.mrb[45].mxu0 }
 0x1ec   : > { %v2973_v55 = vpop.f32.mrb[45].mxu1  ;;  %v2046_v11 = vpop.f32.mrb[46].mxu0 }
 0x1ed   : > { %v2974_v22 = vadd.f32 %v2973_v55, %v2972_v15  ;;  %v2975_v1 = vpop.f32.mrb[46].mxu1  ;;  %v2048_v2 = vpop.f32.mrb[47].mxu0 }
 0x1ee   : > { %v2976_v20 = vpop.f32.mrb[47].mxu1 }
 0x1ef   : > { %v1883_v43 = vadd.f32 %v2974_v22, %v1722_v54  ;;  %v2977_v41 = vadd.f32 %v2976_v20, %v2975_v1 }
 0x1f1   : > { %v2044_v17 = vadd.f32 %v2043_v29, %v1883_v43  ;;  %v1886_v25 = vadd.f32 %v2977_v41, %v1725_v28  ;;  %v1738_v28 = vadd.f32 %v4311_v62, %v4334_v44 }
 0x1f3   : > { %v2349_v63 = vmul.f32 %v2044_v17, %v2044_v17  ;;  %v2047_v53 = vadd.f32 %v2046_v11, %v1886_v25  ;;  %v2978_v51 = vpop.f32.mrb[48].mxu1  ;;  %v2311_v49 = vadd.f32 %v2310_v42, %v2044_v17 }
 0x1f4   : > { %v2979_v52 = vpop.f32.mrb[49].mxu1 }
 0x1f5   : > { %v2749_v40 = vpack.c.bf16 %v2047_v53, %v2044_v17  ;;  %v2350_v3 = vmul.f32 %v2047_v53, %v2047_v53  ;;  %v2980_v19 = vadd.f32 %v2979_v52, %v2978_v51  ;;  %v2981_v12 = vpop.f32.mrb[50].mxu1  ;;  %v2312_v0 = vadd.f32 %v2311_v49, %v2047_v53 }
 0x1f6   : > { %v2982_v61 = vpop.f32.mrb[51].mxu1  ;;  %v2051_v36 = vpop.f32.mrb[48].mxu0  ;;  %v2380_v16 = vadd.f32 %v2379_v31, %v2349_v63  ;;  %v1741_v63 = vadd.f32 %v4313_v35, %v4334_v44 }
 0x1f7   : > { %2813 = vst [vmem:[%s4344_s7 + $0x18] sm:$0xff] %v2749_v40   ;;  %v2983_v14 = vadd.f32 %v2982_v61, %v2981_v12  ;;  %v1891_v46 = vadd.f32 %v2980_v19, %v1730_v32  ;;  %v2053_v27 = vpop.f32.mrb[49].mxu0  ;;  %v1746_v12 = vadd.f32 %v4319_v8, %v4334_v44 }
 0x1f8   : > { %v2381_v30 = vadd.f32 %v2380_v16, %v2350_v3  ;;  %v2054_v58 = vpop.f32.mrb[50].mxu0  ;;  %v1749_v27 = vadd.f32 %v4321_v23, %v4334_v44 }
 0x1f9   : > { %v2052_v34 = vadd.f32 %v2051_v36, %v1891_v46  ;;  %v1894_v33 = vadd.f32 %v2983_v14, %v1733_v5  ;;  %v2056_v42 = vpop.f32.mrb[51].mxu0 }
 0x1fb   : > { %v2313_v24 = vadd.f32 %v2312_v0, %v2052_v34  ;;  %v2351_v29 = vmul.f32 %v2052_v34, %v2052_v34  ;;  %v2055_v15 = vadd.f32 %v2054_v58, %v1894_v33 }
 0x1fd   : > { %v2382_v45 = vadd.f32 %v2381_v30, %v2351_v29  ;;  %v2754_v55 = vpack.c.bf16 %v2055_v15, %v2052_v34  ;;  %v2314_v54 = vadd.f32 %v2313_v24, %v2055_v15  ;;  %v2352_v31 = vmul.f32 %v2055_v15, %v2055_v15 }
 0x1fe   : > { %v2059_v22 = vpop.f32.mrb[52].mxu0 }
 0x1ff   : > { %2814 = vst [vmem:[%s4344_s7 + $0x20] sm:$0xff] %v2754_v55   ;;  %v2383_v4 = vadd.f32 %v2382_v45, %v2352_v31  ;;  %v2984_v11 = vpop.f32.mrb[52].mxu1  ;;  %v2061_v1 = vpop.f32.mrb[53].mxu0 }
 0x200   : > { %v2985_v2 = vpop.f32.mrb[53].mxu1  ;;  %v2062_v20 = vpop.f32.mrb[54].mxu0 }
 0x201   : > { %v2986_v43 = vadd.f32 %v2985_v2, %v2984_v11  ;;  %v2987_v41 = vpop.f32.mrb[54].mxu1  ;;  %v2064_v17 = vpop.f32.mrb[55].mxu0 }
 0x202   : > { %v2988_v25 = vpop.f32.mrb[55].mxu1 }
 0x203   : > { %v1899_v53 = vadd.f32 %v2986_v43, %v1738_v28  ;;  %v2989_v51 = vadd.f32 %v2988_v25, %v2987_v41  ;;  %v1754_v43 = vadd.f32 %v4327_v50, %v4334_v44 }
 0x205   : > { %v2060_v49 = vadd.f32 %v2059_v22, %v1899_v53  ;;  %v1902_v32 = vadd.f32 %v2989_v51, %v1741_v63  ;;  %v1757_v53 = vadd.f32 %v4329_v7, %v4334_v44 }
 0x207   : > { %v2353_v52 = vmul.f32 %v2060_v49, %v2060_v49  ;;  %v2063_v40 = vadd.f32 %v2062_v20, %v1902_v32  ;;  %v2990_v3 = vpop.f32.mrb[56].mxu1  ;;  %v2315_v19 = vadd.f32 %v2314_v54, %v2060_v49 }
 0x208   : > { %v2991_v62 = vpop.f32.mrb[57].mxu1 }
 0x209   : > { %v2759_v0 = vpack.c.bf16 %v2063_v40, %v2060_v49  ;;  %v2354_v61 = vmul.f32 %v2063_v40, %v2063_v40  ;;  %v2992_v36 = vadd.f32 %v2991_v62, %v2990_v3  ;;  %v2993_v16 = vpop.f32.mrb[58].mxu1  ;;  %v2316_v5 = vadd.f32 %v2315_v19, %v2063_v40 }
 0x20a   : > { %v2994_v14 = vpop.f32.mrb[59].mxu1  ;;  %v2067_v35 = vpop.f32.mrb[56].mxu0  ;;  %v2384_v46 = vadd.f32 %v2383_v4, %v2353_v52  ;;  %v1762_v62 = vadd.f32 %v4248_v13, %v4334_v44 }
 0x20b   : > { %2815 = vst [vmem:[%s4344_s7 + $0x28] sm:$0xff] %v2759_v0   ;;  %v2995_v30 = vadd.f32 %v2994_v14, %v2993_v16  ;;  %v1907_v58 = vadd.f32 %v2992_v36, %v1746_v12  ;;  %v2069_v34 = vpop.f32.mrb[57].mxu0 }
 0x20c   : > { %v2385_v33 = vadd.f32 %v2384_v46, %v2354_v61  ;;  %v2070_v42 = vpop.f32.mrb[58].mxu0  ;;  %v1765_v46 = vadd.f32 %v4255_v47, %v4334_v44 }
 0x20d   : > { %v2068_v8 = vadd.f32 %v2067_v35, %v1907_v58  ;;  %v1910_v24 = vadd.f32 %v2995_v30, %v1749_v27  ;;  %v2072_v29 = vpop.f32.mrb[59].mxu0 }
 0x20f   : > { %v2317_v15 = vadd.f32 %v2316_v5, %v2068_v8  ;;  %v2355_v45 = vmul.f32 %v2068_v8, %v2068_v8  ;;  %v2071_v55 = vadd.f32 %v2070_v42, %v1910_v24 }
 0x211   : > { %v2386_v54 = vadd.f32 %v2385_v33, %v2355_v45  ;;  %v2764_v31 = vpack.c.bf16 %v2071_v55, %v2068_v8  ;;  %v2318_v22 = vadd.f32 %v2317_v15, %v2071_v55  ;;  %v2356_v4 = vmul.f32 %v2071_v55, %v2071_v55 }
 0x212   : > { %v2075_v11 = vpop.f32.mrb[60].mxu0 }
 0x213   : > { %2816 = vst [vmem:[%s4344_s7 + $0x30] sm:$0xff] %v2764_v31   ;;  %v2387_v23 = vadd.f32 %v2386_v54, %v2356_v4  ;;  %v2996_v1 = vpop.f32.mrb[60].mxu1  ;;  %v2077_v2 = vpop.f32.mrb[61].mxu0 }
 0x214   : > { %v2997_v20 = vpop.f32.mrb[61].mxu1  ;;  %v2078_v28 = vpop.f32.mrb[62].mxu0  ;;  %v1770_v2 = vadd.f32 %v4261_v9, %v4334_v44 }
 0x215   : > { %v2998_v41 = vadd.f32 %v2997_v20, %v2996_v1  ;;  %v2999_v17 = vpop.f32.mrb[62].mxu1  ;;  %v2080_v25 = vpop.f32.mrb[63].mxu0 }
 0x216   : > { %v3000_v63 = vpop.f32.mrb[63].mxu1 }
 0x217   : > { %v1915_v51 = vadd.f32 %v2998_v41, %v1754_v43  ;;  %v3001_v49 = vadd.f32 %v3000_v63, %v2999_v17  ;;  %v1773_v17 = vadd.f32 %v4267_v60, %v4334_v44 }
 0x219   : > { %v2076_v32 = vadd.f32 %v2075_v11, %v1915_v51  ;;  %v1918_v52 = vadd.f32 %v3001_v49, %v1757_v53 }
 0x21b   : > { %v2357_v40 = vmul.f32 %v2076_v32, %v2076_v32  ;;  %v2079_v3 = vadd.f32 %v2078_v28, %v1918_v52  ;;  %v3002_v19 = vpop.f32.mrb[64].mxu1  ;;  %v2319_v12 = vadd.f32 %v2318_v22, %v2076_v32 }
 0x21c   : > { %v3003_v50 = vpop.f32.mrb[65].mxu1 }
 0x21d   : > { %v2769_v0 = vpack.c.bf16 %v2079_v3, %v2076_v32  ;;  %v2358_v61 = vmul.f32 %v2079_v3, %v2079_v3  ;;  %v3004_v36 = vadd.f32 %v3003_v50, %v3002_v19  ;;  %v3005_v16 = vpop.f32.mrb[66].mxu1  ;;  %v2320_v5 = vadd.f32 %v2319_v12, %v2079_v3 }
 0x21e   : > { %v3006_v14 = vpop.f32.mrb[67].mxu1  ;;  %v2083_v7 = vpop.f32.mrb[64].mxu0  ;;  %v2388_v35 = vadd.f32 %v2387_v23, %v2357_v40  ;;  %v1778_v3 = vadd.f32 %v4274_v6, %v4334_v44 }
 0x21f   : > { %2817 = vst [vmem:[%s4344_s7 + $0x38] sm:$0xff] %v2769_v0   ;;  %v3007_v27 = vadd.f32 %v3006_v14, %v3005_v16  ;;  %v1923_v30 = vadd.f32 %v3004_v36, %v1762_v62  ;;  %v2085_v58 = vpop.f32.mrb[65].mxu0  ;;  %v1781_v16 = vadd.f32 %v4278_v10, %v4334_v44 }
 0x220   : > { %v2389_v34 = vadd.f32 %v2388_v35, %v2358_v61  ;;  %v2086_v33 = vpop.f32.mrb[66].mxu0 }
 0x221   : > { %v2084_v13 = vadd.f32 %v2083_v7, %v1923_v30  ;;  %v1926_v42 = vadd.f32 %v3007_v27, %v1765_v46  ;;  %v2088_v8 = vpop.f32.mrb[67].mxu0 }
 0x223   : > { %v2321_v24 = vadd.f32 %v2320_v5, %v2084_v13  ;;  %v2359_v29 = vmul.f32 %v2084_v13, %v2084_v13  ;;  %v2087_v15 = vadd.f32 %v2086_v33, %v1926_v42 }
 0x225   : > { %v2390_v45 = vadd.f32 %v2389_v34, %v2359_v29  ;;  %v2774_v55 = vpack.c.bf16 %v2087_v15, %v2084_v13  ;;  %v2322_v54 = vadd.f32 %v2321_v24, %v2087_v15  ;;  %v2360_v31 = vmul.f32 %v2087_v15, %v2087_v15 }
 0x226   : > { %v2091_v22 = vpop.f32.mrb[68].mxu0 }
 0x227   : > { %2818 = vst [vmem:[%s4344_s7 + $0x40] sm:$0xff] %v2774_v55   ;;  %v2391_v47 = vadd.f32 %v2390_v45, %v2360_v31  ;;  %v3008_v4 = vpop.f32.mrb[68].mxu1  ;;  %v2093_v11 = vpop.f32.mrb[69].mxu0  ;;  %v1786_v31 = vadd.f32 %v4291_v38, %v4334_v44 }
 0x228   : > { %v3009_v23 = vpop.f32.mrb[69].mxu1  ;;  %v2094_v1 = vpop.f32.mrb[70].mxu0 }
 0x229   : > { %v3010_v20 = vadd.f32 %v3009_v23, %v3008_v4  ;;  %v3011_v28 = vpop.f32.mrb[70].mxu1  ;;  %v2096_v43 = vpop.f32.mrb[71].mxu0  ;;  %v1789_v23 = vadd.f32 %v4293_v37, %v4334_v44 }
 0x22a   : > { %v3012_v41 = vpop.f32.mrb[71].mxu1 }
 0x22b   : > { %v1931_v25 = vadd.f32 %v3010_v20, %v1770_v2  ;;  %v3013_v63 = vadd.f32 %v3012_v41, %v3011_v28 }
 0x22d   : > { %v2092_v53 = vadd.f32 %v2091_v22, %v1931_v25  ;;  %v1934_v51 = vadd.f32 %v3013_v63, %v1773_v17  ;;  %v1794_v63 = vadd.f32 %v4299_v48, %v4334_v44 }
 0x22f   : > { %v2361_v49 = vmul.f32 %v2092_v53, %v2092_v53  ;;  %v2095_v32 = vadd.f32 %v2094_v1, %v1934_v51  ;;  %v3014_v52 = vpop.f32.mrb[72].mxu1  ;;  %v2323_v40 = vadd.f32 %v2322_v54, %v2092_v53 }
 0x230   : > { %v3015_v9 = vpop.f32.mrb[73].mxu1 }
 0x231   : > { %v2779_v19 = vpack.c.bf16 %v2095_v32, %v2092_v53  ;;  %v2362_v12 = vmul.f32 %v2095_v32, %v2095_v32  ;;  %v3016_v62 = vadd.f32 %v3015_v9, %v3014_v52  ;;  %v3017_v50 = vpop.f32.mrb[74].mxu1  ;;  %v2324_v0 = vadd.f32 %v2323_v40, %v2095_v32 }
 0x232   : > { %v3018_v61 = vpop.f32.mrb[75].mxu1  ;;  %v2099_v60 = vpop.f32.mrb[72].mxu0  ;;  %v2392_v36 = vadd.f32 %v2391_v47, %v2361_v49  ;;  %v1797_v9 = vadd.f32 %v4301_v59, %v4334_v44 }
 0x233   : > { %2819 = vst [vmem:[%s4344_s7 + $0x48] sm:$0xff] %v2779_v19   ;;  %v3019_v5 = vadd.f32 %v3018_v61, %v3017_v50  ;;  %v1939_v14 = vadd.f32 %v3016_v62, %v1778_v3  ;;  %v2101_v7 = vpop.f32.mrb[73].mxu0 }
 0x234   : > { %v2393_v35 = vadd.f32 %v2392_v36, %v2362_v12  ;;  %v2102_v46 = vpop.f32.mrb[74].mxu0 }
 0x235   : > { %v2100_v6 = vadd.f32 %v2099_v60, %v1939_v14  ;;  %v1942_v27 = vadd.f32 %v3019_v5, %v1781_v16  ;;  %v2104_v30 = vpop.f32.mrb[75].mxu0 }
 0x237   : > { %v2325_v58 = vadd.f32 %v2324_v0, %v2100_v6  ;;  %v2363_v34 = vmul.f32 %v2100_v6, %v2100_v6  ;;  %v2103_v33 = vadd.f32 %v2102_v46, %v1942_v27 }
 0x239   : > { %v2394_v13 = vadd.f32 %v2393_v35, %v2363_v34  ;;  %v2784_v42 = vpack.c.bf16 %v2103_v33, %v2100_v6  ;;  %v2326_v8 = vadd.f32 %v2325_v58, %v2103_v33  ;;  %v2364_v24 = vmul.f32 %v2103_v33, %v2103_v33 }
 0x23a   : > { %v2107_v29 = vpop.f32.mrb[76].mxu0  ;;  %v1802_v34 = vadd.f32 %v4307_v57, %v4334_v44 }
 0x23b   : > { %2820 = vst [vmem:[%s4344_s7 + $0x50] sm:$0xff] %v2784_v42   ;;  %v2395_v10 = vadd.f32 %v2394_v13, %v2364_v24  ;;  %v3020_v15 = vpop.f32.mrb[76].mxu1  ;;  %v2109_v45 = vpop.f32.mrb[77].mxu0 }
 0x23c   : > { %v3021_v55 = vpop.f32.mrb[77].mxu1  ;;  %v2110_v54 = vpop.f32.mrb[78].mxu0 }
 0x23d   : > { %v3022_v22 = vadd.f32 %v3021_v55, %v3020_v15  ;;  %v3023_v47 = vpop.f32.mrb[78].mxu1  ;;  %v2112_v4 = vpop.f32.mrb[79].mxu0 }
 0x23e   : > { %v3024_v11 = vpop.f32.mrb[79].mxu1 }
 0x23f   : > { %v1947_v1 = vadd.f32 %v3022_v22, %v1786_v31  ;;  %v3025_v2 = vadd.f32 %v3024_v11, %v3023_v47 }
 0x241   : > { %v2108_v20 = vadd.f32 %v2107_v29, %v1947_v1  ;;  %v1950_v28 = vadd.f32 %v3025_v2, %v1789_v23  ;;  %v1805_v29 = vadd.f32 %v4309_v56, %v4334_v44  ;;  %v1810_v2 = vadd.f32 %v4315_v26, %v4334_v44 }
 0x243   : > { %v2365_v43 = vmul.f32 %v2108_v20, %v2108_v20  ;;  %v2111_v41 = vadd.f32 %v2110_v54, %v1950_v28  ;;  %v3026_v17 = vpop.f32.mrb[80].mxu1  ;;  %v2327_v25 = vadd.f32 %v2326_v8, %v2108_v20 }
 0x244   : > { %v3027_v38 = vpop.f32.mrb[81].mxu1 }
 0x245   : > { %v2789_v53 = vpack.c.bf16 %v2111_v41, %v2108_v20  ;;  %v2366_v51 = vmul.f32 %v2111_v41, %v2111_v41  ;;  %v3028_v49 = vadd.f32 %v3027_v38, %v3026_v17  ;;  %v3029_v32 = vpop.f32.mrb[82].mxu1  ;;  %v2328_v52 = vadd.f32 %v2327_v25, %v2111_v41 }
 0x246   : > { %v3030_v40 = vpop.f32.mrb[83].mxu1  ;;  %v2115_v37 = vpop.f32.mrb[80].mxu0  ;;  %v2396_v3 = vadd.f32 %v2395_v10, %v2365_v43  ;;  %v1813_v25 = vadd.f32 %v4317_v18, %v4334_v44 }
 0x247   : > { %2821 = vst [vmem:[%s4344_s7 + $0x58] sm:$0xff] %v2789_v53   ;;  %v3031_v19 = vadd.f32 %v3030_v40, %v3029_v32  ;;  %v1955_v12 = vadd.f32 %v3028_v49, %v1794_v63  ;;  %v2117_v62 = vpop.f32.mrb[81].mxu0 }
 0x248   : > { %v2397_v50 = vadd.f32 %v2396_v3, %v2366_v51  ;;  %v2118_v0 = vpop.f32.mrb[82].mxu0 }
 0x249   : > { %v2116_v48 = vadd.f32 %v2115_v37, %v1955_v12  ;;  %v1958_v61 = vadd.f32 %v3031_v19, %v1797_v9  ;;  %v2120_v60 = vpop.f32.mrb[83].mxu0 }
 0x24b   : > { %v2329_v36 = vadd.f32 %v2328_v52, %v2116_v48  ;;  %v2367_v16 = vmul.f32 %v2116_v48, %v2116_v48  ;;  %v2119_v5 = vadd.f32 %v2118_v0, %v1958_v61 }
 0x24d   : > { %v2398_v14 = vadd.f32 %v2397_v50, %v2367_v16  ;;  %v2794_v7 = vpack.c.bf16 %v2119_v5, %v2116_v48  ;;  %v2330_v35 = vadd.f32 %v2329_v36, %v2119_v5  ;;  %v2368_v46 = vmul.f32 %v2119_v5, %v2119_v5 }
 0x24e   : > { %v2123_v59 = vpop.f32.mrb[84].mxu0  ;;  %v1818_v48 = vadd.f32 %v4323_v39, %v4334_v44 }
 0x24f   : > { %2822 = vst [vmem:[%s4344_s7 + $0x60] sm:$0xff] %v2794_v7   ;;  %v2399_v6 = vadd.f32 %v2398_v14, %v2368_v46  ;;  %v3032_v27 = vpop.f32.mrb[84].mxu1  ;;  %v2125_v30 = vpop.f32.mrb[85].mxu0  ;;  %v1821_v14 = vadd.f32 %v4325_v21, %v4334_v44 }
 0x250   : > { %v3033_v58 = vpop.f32.mrb[85].mxu1  ;;  %v2126_v13 = vpop.f32.mrb[86].mxu0 }
 0x251   : > { %v3034_v33 = vadd.f32 %v3033_v58, %v3032_v27  ;;  %v3035_v42 = vpop.f32.mrb[86].mxu1  ;;  %v2128_v8 = vpop.f32.mrb[87].mxu0 }
 0x252   : > { %v3036_v24 = vpop.f32.mrb[87].mxu1 }
 0x253   : > { %v1963_v10 = vadd.f32 %v3034_v33, %v1802_v34  ;;  %v3037_v15 = vadd.f32 %v3036_v24, %v3035_v42 }
 0x255   : > { %v2124_v45 = vadd.f32 %v2123_v59, %v1963_v10  ;;  %v1966_v55 = vadd.f32 %v3037_v15, %v1805_v29 }
 0x257   : > { %v2369_v54 = vmul.f32 %v2124_v45, %v2124_v45  ;;  %v2127_v31 = vadd.f32 %v2126_v13, %v1966_v55  ;;  %v2331_v22 = vadd.f32 %v2330_v35, %v2124_v45 }
 0x258   : > { %v3038_v47 = vpop.f32.mrb[88].mxu1 }
 0x259   : > { %v2799_v4 = vpack.c.bf16 %v2127_v31, %v2124_v45  ;;  %v2370_v11 = vmul.f32 %v2127_v31, %v2127_v31  ;;  %v3039_v57 = vpop.f32.mrb[89].mxu1  ;;  %v2332_v23 = vadd.f32 %v2331_v22, %v2127_v31  ;;  %v2400_v1 = vadd.f32 %v2399_v6, %v2369_v54 }
 0x25a   : > { %v3040_v20 = vadd.f32 %v3039_v57, %v3038_v47  ;;  %v3041_v28 = vpop.f32.mrb[90].mxu1  ;;  %v2131_v56 = vpop.f32.mrb[88].mxu0 }
 0x25b   : > { %2823 = vst [vmem:[%s4344_s7 + $0x68] sm:$0xff] %v2799_v4   ;;  %v3042_v43 = vpop.f32.mrb[91].mxu1  ;;  %v2401_v41 = vadd.f32 %v2400_v1, %v2370_v11  ;;  %v2133_v17 = vpop.f32.mrb[89].mxu0 }
 0x25c   : > { %v3043_v63 = vadd.f32 %v3042_v43, %v3041_v28  ;;  %v1971_v38 = vadd.f32 %v3040_v20, %v1810_v2  ;;  %v2134_v53 = vpop.f32.mrb[90].mxu0 }
 0x25d   : > { %v2136_v51 = vpop.f32.mrb[91].mxu0 }
 0x25e   : > { %v2132_v49 = vadd.f32 %v2131_v56, %v1971_v38  ;;  %v1974_v32 = vadd.f32 %v3043_v63, %v1813_v25 }
 0x260   : > { %v2333_v52 = vadd.f32 %v2332_v23, %v2132_v49  ;;  %v2371_v40 = vmul.f32 %v2132_v49, %v2132_v49  ;;  %v2135_v26 = vadd.f32 %v2134_v53, %v1974_v32 }
 0x262   : > { %v2402_v37 = vadd.f32 %v2401_v41, %v2371_v40  ;;  %v2804_v3 = vpack.c.bf16 %v2135_v26, %v2132_v49  ;;  %v2334_v9 = vadd.f32 %v2333_v52, %v2135_v26  ;;  %v2372_v19 = vmul.f32 %v2135_v26, %v2135_v26 }
 0x263   : > { %v2139_v12 = vpop.f32.mrb[92].mxu0  ;;  %v3044_v62 = vpop.f32.mrb[92].mxu1 }
 0x264   : > { %2824 = vst [vmem:[%s4344_s7 + $0x70] sm:$0xff] %v2804_v3   ;;  %v2403_v18 = vadd.f32 %v2402_v37, %v2372_v19  ;;  %v2141_v50 = vpop.f32.mrb[93].mxu0  ;;  %v3045_v0 = vpop.f32.mrb[93].mxu1 }
 0x265   : > { %v3046_v61 = vadd.f32 %v3045_v0, %v3044_v62  ;;  %v2142_v60 = vpop.f32.mrb[94].mxu0  ;;  %v3047_v36 = vpop.f32.mrb[94].mxu1 }
 0x266   : > { %v2144_v16 = vpop.f32.mrb[95].mxu0  ;;  %v3048_v5 = vpop.f32.mrb[95].mxu1 }
 0x267   : > { %v1979_v7 = vadd.f32 %v3046_v61, %v1818_v48  ;;  %v3049_v35 = vadd.f32 %v3048_v5, %v3047_v36 }
 0x269   : > { %v2140_v46 = vadd.f32 %v2139_v12, %v1979_v7  ;;  %v1982_v6 = vadd.f32 %v3049_v35, %v1821_v14 }
 0x26b   : > { %v2335_v59 = vadd.f32 %v2334_v9, %v2140_v46  ;;  %v2373_v27 = vmul.f32 %v2140_v46, %v2140_v46  ;;  %v2143_v39 = vadd.f32 %v2142_v60, %v1982_v6 }
 0x26d   : > { %v2404_v30 = vadd.f32 %v2403_v18, %v2373_v27  ;;  %v2809_v58 = vpack.c.bf16 %v2143_v39, %v2140_v46  ;;  %v2336_v21 = vadd.f32 %v2335_v59, %v2143_v39  ;;  %v2374_v44 = vmul.f32 %v2143_v39, %v2143_v39 }
 0x26f   : > { %2825 = vst [vmem:[%s4344_s7 + $0x78] sm:$0xff] %v2809_v58   ;;  %v2337_v34 = vrot.slane %v2336_v21, 4  ;;  %v2405_v33 = vadd.f32 %v2404_v30, %v2374_v44 }
 0x270   : > { %3231 = shalt.err (!%p3228_p5)
}
 0x271   : > { %s3232_s21 = scalar_lea.hbm %s4426_s9, 2048  ;;  %s3236_s7 = scalar_lea.hbm %s4513_s3, 4096 }
 0x272   : > { %p3233_p6 = scmp.ne.s32.totalorder %s4426_s9, %s3232_s21  ;;  %p3237_p10 = scmp.lt.u32.totalorder %s4426_s9, %s4513_s3 }
 0x273   : > { %p3238_p11 = scmp.lt.u32.totalorder %s3236_s7, %s3232_s21  ;;  %p3240_p13 = scmp.lt.u32.totalorder %s3232_s21, %s4426_s9 }
 0x274   : > { %p3234_p7 = pnand %p3233_p6, %p3407_p4 }
 0x275   : > { %p3239_p12 = por %p3238_p11, %p3237_p10 }
 0x276   : > { %p3235_p9 = pneg %p3234_p7 }
 0x277   : > { %p3241_p0 = por %p3240_p13, %p3239_p12 }
 0x279   : > { %p3242_p1 = pnand %p3241_p0, %p3235_p9 }
 0x27b   : > { %3245 = shalt.err (!%p3242_p1)
}
 0x27c   : > { %s3340_s8 = smov 4   ;;  %v2338_v13 = vadd.f32 %v2337_v34, %v2336_v21  ;;  %v2406_v42 = vrot.slane %v2405_v33, 4  ;;  %s2563_s11 = sshll.u32 %s4339_s6, 1  ;;  %vm2412_vm12 = vcmask 1040384  }
 0x27d   : > { %3067 = dma.vmem_to_hbm [thread:$0]  (%p3407_p4), %s4428_s24, 2048, %s4426_s9, %s2416_s10, %s3338_s26, %s3338_s26, %s3340_s8  }
 0x27e   : > { %v2339_v8 = vrot.slane %v2338_v13, 2  ;;  %v2407_v24 = vadd.f32 %v2406_v42, %v2405_v33  ;;  %s2695_s12 = sshll.u32 %s3320_s18, 5  ;;  %s217_s13 = scalar_lea.vmem [#allocation4], %s2563_s11 }
 0x27f   : > { %s2454_s14 = sshll.u32 %s217_s13, 4  ;;  %s4462_s24 = scalar_lea.hbm %s4514_s4, %s2695_s12  ;;  %s4464_s14 = int_to_ptr.vmem [resolvable:$true] %s2454_s14 }
 0x280   : > { %v2340_v29 = vadd.f32 %v2339_v8, %v2338_v13  ;;  %v2408_v10 = vrot.slane %v2407_v24, 2  ;;  %s2421_s9 = scalar_lea.sflag [#allocation5], %s4339_s6  ;;  %s3246_s10 = scalar_lea.vmem %s4464_s14, 32 }
 0x281   : > { %p3247_p2 = scmp.ne.s32.totalorder %s4464_s14, %s3246_s10  ;;  %s3341_s18 = smov [#allocation4]  }
 0x282   : > { %v2341_v15 = vrot.slane %v2340_v29, 1  ;;  %v2409_v45 = vadd.f32 %v2408_v10, %v2407_v24  ;;  %s3250_s5 = sshll.u32 %s3341_s18, 4  ;;  %s3251_s5 = int_to_ptr.vmem [resolvable:$false] %s3250_s5 }
 0x283   : > { %p3248_p3 = pnand %p3247_p2, %p3407_p4  ;;  %s3252_s30 = scalar_lea.vmem %s3251_s5, 64 }
 0x284   : > { %v2410_v55 = vrot.slane %v2409_v45, 1  ;;  %v2342_v54 = vadd.f32 %v2341_v15, %v2340_v29  ;;  %p3253_p6 = scmp.lt.s32.totalorder %s4464_s14, %s3251_s5  ;;  %p3254_p7 = scmp.lt.s32.totalorder %s3252_s30, %s3246_s10 }
 0x285   : > { %p3249_p5 = pneg %p3248_p3 }
 0x286   : > { %v2411_v31 = vadd.f32 %v2410_v55, %v2409_v45  ;;  %p3255_p9 = por %p3254_p7, %p3253_p6 }
 0x288   : > { %v2413_v22 = vsel %vm2412_vm12, %v2342_v54, %v2411_v31  ;;  %p3256_p10 = pnand %p3255_p9, %p3249_p5 }
 0x289   : > { %2414 = vst [vmem:[%s217_s13] sm:$0x3] %v2413_v22 }
 0x28a   : > { %3259 = shalt.err (!%p3256_p10)
}
 0x28b   : > { %s3260_s6 = scalar_lea.hbm %s4462_s24, 32  ;;  %s3264_s29 = scalar_lea.hbm %s4514_s4, 64 }
 0x28c   : > { %p3261_p11 = scmp.ne.s32.totalorder %s4462_s24, %s3260_s6  ;;  %p3265_p0 = scmp.lt.u32.totalorder %s4462_s24, %s4514_s4 }
 0x28d   : > { %p3266_p1 = scmp.lt.u32.totalorder %s3264_s29, %s3260_s6  ;;  %p3268_p3 = scmp.lt.u32.totalorder %s3260_s6, %s4462_s24 }
 0x28e   : > { %p3262_p12 = pnand %p3261_p11, %p3407_p4 }
 0x28f   : > { %p3267_p2 = por %p3266_p1, %p3265_p0 }
 0x290   : > { %p3263_p13 = pneg %p3262_p12 }
 0x291   : > { %p3269_p5 = por %p3268_p3, %p3267_p2 }
 0x293   : > { %p3270_p6 = pnand %p3269_p5, %p3263_p13 }
 0x295   : > { %3273 = shalt.err (!%p3270_p6)
}
 0x296   : > { %3068 = dma.vmem_to_hbm [thread:$0]  (%p3407_p4), %s4464_s14, 32, %s4462_s24, %s2421_s9  }
 0x297 PF: > { %p3078_p7 = scmp.ge.s32.totalorder %s3328_s20, 2  ;;  %s2466_s12 = sand.u32 1, %s3308_s15  }
 0x298   : > { %s2467_s13 = scalar_lea.sflag [#allocation3], %s2466_s12 }
 0x299   : > { %p3072_p9 = pnand %p3078_p7, %p3414_p8 }
 0x29b   : > { %3299 = dma.done.wait (!%p3072_p9), %s2467_s13, 2048  }
 0x29c   : > { %3301 = vsyncadd (!%p3072_p9), %s2467_s13, 4294965248  ;;  %s2476_s21 = scalar_lea.sflag [#allocation5], %s2466_s12 }
 0x29d   : > { %3303 = dma.done.wait (!%p3072_p9), %s2476_s21, 32  }
 0x29e   : > { %3305 = vsyncadd (!%p3072_p9), %s2476_s21, 4294967264  ;;  %s21_s20 = sadd.s32 1, %s3328_s20   ;;  %s4517_s15 = smov %s3312_s16 }
 0x29f   : > { %p18_p10 = scmp.ge.s32.totalorder %s21_s20, 4   ;;  %s4518_s16 = smov %s3316_s17 }
 0x2a0   : > { %s4519_s17 = smov %s3420_s28  ;;  %s4520_s18 = smov %s3324_s19 }
 0x2a1   : > { %s4521_s19 = smov %s4523_s23  ;;  %20 = sbr.rel (!%p18_p10) target bundleno = 6 (0x6), region = 84 }
 0x2a8   :  { %2481 = vsyncpa [#allocation3], 1 }
 0x2a9   :  { %2483 = vsyncpa [#allocation3 + $0x1], 1 }
 0x2aa   :  { %2484 = vsyncpa [#allocation5], 1 }
 0x2ab   :  { %2486 = vsyncpa [#allocation5 + $0x1], 1 }

</bundles_post_ra>
